<compile_context>
chip_gen: v7x
topology: tpu7x:2x2x1
jax: 0.10.0
libtpu: 0.0.40
codegen_flags: <defaults>
</compile_context>

<pallas_src>
import functools

import jax
import jax.numpy as jnp
from jax.experimental import pallas as pl
from jax.experimental.pallas import tpu as pltpu

HIDDEN = 100
IN_FEATURES = 9
BN_EPS = 1e-5


def _round_up(n, m):
    return ((n + m - 1) // m) * m


def _vmem_limit_bytes():
    """Generation-aware scoped-VMEM cap.

    v5e/v6e have 128 MiB physical VMEM -> allow 64 MiB; anything else
    (v7x with 64 MiB physical, unknown/CPU-interpret) stays at a safe 32 MiB.
    """
    try:
        kind = jax.devices()[0].device_kind.lower()
    except Exception:
        kind = ""
    if "v5 lite" in kind or "v5e" in kind or "v5litepod" in kind or "v6" in kind:
        return 64 * 1024 * 1024
    return 32 * 1024 * 1024


def _bn_affine(sum1, sum2, gamma, beta, n):
    """(scale, shift) such that BN(x) = x*scale + shift, from global sums."""
    inv_n = 1.0 / float(n)
    mean = sum1 * inv_n
    var = sum2 * inv_n - mean * mean              # fused one-pass moments
    scale = gamma * jax.lax.rsqrt(var + BN_EPS)   # gamma / sqrt(var + eps)
    shift = beta - mean * scale                   # beta - mean * scale
    return scale, shift


def _accum_stats(stats_ref, base, h, tile_idx, *, tile_b, b_true,
                 num_tiles, masked):
    """stats_ref[base] += sum(h); stats_ref[base+1] += sum(h*h).

    Padded batch rows are excluded; the masking work is paid only on the last
    tile (the only tile that can contain padding) and skipped entirely when
    the batch needed no padding.
    """
    def add(hm):
        stats_ref[base] += jnp.sum(hm)
        stats_ref[base + 1] += jnp.sum(hm * hm)

    if not masked:
        add(h)
        return

    @pl.when(tile_idx == num_tiles - 1)
    def _():
        rows = (jax.lax.broadcasted_iota(jnp.int32, (h.shape[0], 1), 0)
                + tile_idx * tile_b)
        add(jnp.where(rows < b_true, h, 0.0))

    @pl.when(tile_idx != num_tiles - 1)
    def _():
        add(h)


# ---------------------------------------------------------------------------
# Fused single-call path: activations stay in VMEM scratch across all layers.
# Grid = (4 layer passes [arbitrary], batch tiles [arbitrary]); the SMEM stats
# scratch and the VMEM activation scratch persist across the whole grid.
# ---------------------------------------------------------------------------
def _fused_kernel(x_ref, w1_ref, w2_ref, w3_ref, bn_ref, out_ref,
                  h_sc, h3_sc, stats_sc, *, b_true, tile_b, num_tiles, masked):
    p = pl.program_id(0)   # layer pass (sequential)
    i = pl.program_id(1)   # batch tile (sequential: shared scratch + stats)

    @pl.when((p == 0) & (i == 0))
    def _():
        for k in range(6):
            stats_sc[k] = 0.0

    row0 = pl.multiple_of(i * tile_b, 8)
    rows = pl.ds(row0, tile_b)

    # Pass 0: h1 = x @ w1 -> VMEM scratch; accumulate BN1 stats.
    @pl.when(p == 0)
    def _():
        h1 = jnp.dot(x_ref[...], w1_ref[...],
                     preferred_element_type=jnp.float32)
        h_sc[rows, :] = h1
        _accum_stats(stats_sc, 0, h1, i, tile_b=tile_b, b_true=b_true,
                     num_tiles=num_tiles, masked=masked)

    # Pass 1: h2 = relu(BN1(h1)) @ w2 -> scratch (in place); BN2 stats.
    @pl.when(p == 1)
    def _():
        scale, shift = _bn_affine(stats_sc[0], stats_sc[1],
                                  bn_ref[0], bn_ref[1], b_true * HIDDEN)
        a = jnp.maximum(h_sc[rows, :] * scale + shift, 0.0)
        h2 = jnp.dot(a, w2_ref[...], preferred_element_type=jnp.float32)
        h_sc[rows, :] = h2
        _accum_stats(stats_sc, 2, h2, i, tile_b=tile_b, b_true=b_true,
                     num_tiles=num_tiles, masked=masked)

    # Pass 2: h3 = relu(BN2(h2)) @ w3 -> small scratch; BN3 stats.
    @pl.when(p == 2)
    def _():
        scale, shift = _bn_affine(stats_sc[2], stats_sc[3],
                                  bn_ref[2], bn_ref[3], b_true * HIDDEN)
        a = jnp.maximum(h_sc[rows, :] * scale + shift, 0.0)
        h3 = jnp.dot(a, w3_ref[...], preferred_element_type=jnp.float32)
        h3_sc[rows, :] = h3
        _accum_stats(stats_sc, 4, h3, i, tile_b=tile_b, b_true=b_true,
                     num_tiles=num_tiles, masked=masked)

    # Pass 3: softmax(BN3(h3)).  The BN mean/beta shift is constant along the
    # softmax axis and cancels exactly, so only the scale is applied.
    @pl.when(p == 3)
    def _():
        scale, _ = _bn_affine(stats_sc[4], stats_sc[5],
                              bn_ref[4], bn_ref[5], b_true * IN_FEATURES)
        z = h3_sc[rows, :] * scale
        m = jnp.max(z, axis=-1, keepdims=True)
        e = jnp.exp(z - m)
        out_ref[...] = e / jnp.sum(e, axis=-1, keepdims=True)   # exact

    # The revisited output block is still written back on passes 0-2; keep the
    # bytes defined (pass 3 comes last per block and overwrites with the real
    # values).
    @pl.when(p != 3)
    def _():
        out_ref[...] = jnp.zeros_like(out_ref)


# ---------------------------------------------------------------------------
# Tiled fallback path (batches too large for the VMEM-resident fused path).
# ---------------------------------------------------------------------------
def _lin_stats_kernel(x_ref, w1_ref, stats_ref, *,
                      b_true, tile_b, num_tiles, masked):
    """Stats-only: accumulate (sum, sum_sq) of h1 = x @ w1 (h1 never hits HBM)."""
    i = pl.program_id(0)

    @pl.when(i == 0)
    def _():
        stats_ref[0] = 0.0
        stats_ref[1] = 0.0

    h1 = jnp.dot(x_ref[...], w1_ref[...], preferred_element_type=jnp.float32)
    _accum_stats(stats_ref, 0, h1, i, tile_b=tile_b, b_true=b_true,
                 num_tiles=num_tiles, masked=masked)


def _recompute_bn_relu_lin_kernel(stats_in_ref, bn_ref, x_ref, w1_ref, w2_ref,
                                  h_out_ref, stats_out_ref, *,
                                  n_prev, b_true, tile_b, num_tiles, masked):
    """Recompute h1 = x @ w1 in-kernel (cheaper than re-reading it from HBM),
    then h2 = relu(BN1(h1)) @ w2; accumulate stats of h2."""
    i = pl.program_id(0)

    @pl.when(i == 0)
    def _():
        stats_out_ref[0] = 0.0
        stats_out_ref[1] = 0.0

    scale, shift = _bn_affine(stats_in_ref[0], stats_in_ref[1],
                              bn_ref[0], bn_ref[1], n_prev)
    h1 = jnp.dot(x_ref[...], w1_ref[...], preferred_element_type=jnp.float32)
    a = jnp.maximum(h1 * scale + shift, 0.0)
    h2 = jnp.dot(a, w2_ref[...], preferred_element_type=jnp.float32)
    h_out_ref[...] = h2
    _accum_stats(stats_out_ref, 0, h2, i, tile_b=tile_b, b_true=b_true,
                 num_tiles=num_tiles, masked=masked)


def _bn_relu_lin_stats_kernel(stats_in_ref, bn_ref, h_in_ref, w_ref,
                              h_out_ref, stats_out_ref, *,
                              n_prev, b_true, tile_b, num_tiles, masked):
    """h_out = relu(BN(h_in; global stats)) @ w; accumulate stats of h_out."""
    i = pl.program_id(0)

    @pl.when(i == 0)
    def _():
        stats_out_ref[0] = 0.0
        stats_out_ref[1] = 0.0

    scale, shift = _bn_affine(stats_in_ref[0], stats_in_ref[1],
                              bn_ref[0], bn_ref[1], n_prev)
    a = jnp.maximum(h_in_ref[...] * scale + shift, 0.0)
    h = jnp.dot(a, w_ref[...], preferred_element_type=jnp.float32)
    h_out_ref[...] = h
    _accum_stats(stats_out_ref, 0, h, i, tile_b=tile_b, b_true=b_true,
                 num_tiles=num_tiles, masked=masked)


def _bn_softmax_kernel(stats_in_ref, bn_ref, h_in_ref, out_ref, *, n_prev):
    """softmax(BN(h_in)) along features (BN shift cancels under softmax)."""
    scale, _ = _bn_affine(stats_in_ref[0], stats_in_ref[1],
                          bn_ref[0], bn_ref[1], n_prev)
    z = h_in_ref[...] * scale
    m = jnp.max(z, axis=-1, keepdims=True)
    e = jnp.exp(z - m)
    out_ref[...] = e / jnp.sum(e, axis=-1, keepdims=True)   # exact division


# ---------------------------------------------------------------------------
# Wrapper
# ---------------------------------------------------------------------------
def model_forward(x, w1, w2, w3, bn_params, *, tile_b=4096, force_tiled=False):
    """x: (B, 1, 9) float32 -> (B, 1, 9) float32 softmax probabilities.

    Weights are stored transposed ((in, out)) so kernels compute x @ W.
    bn_params is a flat (6,) array [g1, b1, g2, b2, g3, b3].
    """
    B = x.shape[0]
    assert x.shape[1:] == (1, IN_FEATURES), x.shape
    x2d = x.reshape(B, IN_FEATURES).astype(jnp.float32)

    # Batch tiling: tile must be a multiple of 8 (sublane); pad batch to a
    # multiple of the tile (padded rows are masked out of the BN statistics).
    tile_b = _round_up(max(8, min(tile_b, _round_up(B, 8))), 8)
    b_pad = _round_up(B, tile_b)
    if b_pad != B:
        x2d = jnp.pad(x2d, ((0, b_pad - B), (0, 0)))
    num_tiles = b_pad // tile_b
    masked = b_pad != B

    bn = jnp.reshape(bn_params.astype(jnp.float32), (-1,))
    vmem_limit = _vmem_limit_bytes()

    smem_spec = pl.BlockSpec(memory_space=pltpu.MemorySpace.SMEM)
    stats_shape = jax.ShapeDtypeStruct((2,), jnp.float32)
    kw = dict(b_true=B, tile_b=tile_b, num_tiles=num_tiles, masked=masked)

    # ---------------- Fused single-call path (activations never hit HBM) ----
    lane = 128  # minor dim is lane-padded to 128 in VMEM
    fused_vmem = (2 * b_pad * lane * 4                 # h scratch + h3 scratch
                  + 2 * 2 * tile_b * lane * 4          # x/out double buffers
                  + (IN_FEATURES + 2 * HIDDEN) * lane * 4)  # resident weights
    if (not force_tiled) and fused_vmem <= int(0.7 * vmem_limit):
        out_pad = pl.pallas_call(
            functools.partial(_fused_kernel, **kw),
            grid=(4, num_tiles),
            in_specs=[
                pl.BlockSpec((tile_b, IN_FEATURES), lambda p, i: (i, 0)),  # x
                pl.BlockSpec((IN_FEATURES, HIDDEN), lambda p, i: (0, 0)),  # w1
                pl.BlockSpec((HIDDEN, HIDDEN), lambda p, i: (0, 0)),       # w2
                pl.BlockSpec((HIDDEN, IN_FEATURES), lambda p, i: (0, 0)),  # w3
                smem_spec,                                                 # bn
            ],
            out_specs=pl.BlockSpec((tile_b, IN_FEATURES), lambda p, i: (i, 0)),
            out_shape=jax.ShapeDtypeStruct((b_pad, IN_FEATURES), jnp.float32),
            scratch_shapes=[
                pltpu.VMEM((b_pad, HIDDEN), jnp.float32),      # h1/h2 (reused)
                pltpu.VMEM((b_pad, IN_FEATURES), jnp.float32),  # h3
                pltpu.SMEM((6,), jnp.float32),                  # BN stats
            ],
            compiler_params=pltpu.CompilerParams(
                dimension_semantics=("arbitrary", "arbitrary"),
                vmem_limit_bytes=vmem_limit),
        )(x2d, w1, w2, w3, bn)
        return out_pad[:B].reshape(B, 1, IN_FEATURES)

    # ---------------- Tiled fallback (very large batches) -------------------
    reduce_params = pltpu.CompilerParams(
        dimension_semantics=("arbitrary",),   # resident SMEM stats accumulator
        vmem_limit_bytes=vmem_limit)
    parallel_params = pltpu.CompilerParams(
        dimension_semantics=("parallel",),    # no cross-tile dependence
        vmem_limit_bytes=vmem_limit)

    def act_spec(feat):
        return pl.BlockSpec((tile_b, feat), lambda i: (i, 0))

    def w_spec(shape):
        return pl.BlockSpec(shape, lambda i: (0, 0))   # resident across grid

    # Layer 1: stats of h1 = x @ w1 only (h1 is NOT written to HBM).
    stats1 = pl.pallas_call(
        functools.partial(_lin_stats_kernel, **kw),
        grid=(num_tiles,),
        in_specs=[act_spec(IN_FEATURES), w_spec((IN_FEATURES, HIDDEN))],
        out_specs=smem_spec,
        out_shape=stats_shape,
        compiler_params=reduce_params,
    )(x2d, w1)

    # Layer 2: recompute h1, BN1 + ReLU, h2 = a @ w2, stats of h2.
    h2, stats2 = pl.pallas_call(
        functools.partial(_recompute_bn_relu_lin_kernel,
                          n_prev=B * HIDDEN, **kw),
        grid=(num_tiles,),
        in_specs=[smem_spec, smem_spec, act_spec(IN_FEATURES),
                  w_spec((IN_FEATURES, HIDDEN)), w_spec((HIDDEN, HIDDEN))],
        out_specs=[act_spec(HIDDEN), smem_spec],
        out_shape=[jax.ShapeDtypeStruct((b_pad, HIDDEN), jnp.float32),
                   stats_shape],
        compiler_params=reduce_params,
    )(stats1, bn[0:2], x2d, w1, w2)

    # Layer 3: BN2 + ReLU, h3 = a @ w3, stats of h3.
    h3, stats3 = pl.pallas_call(
        functools.partial(_bn_relu_lin_stats_kernel,
                          n_prev=B * HIDDEN, **kw),
        grid=(num_tiles,),
        in_specs=[smem_spec, smem_spec, act_spec(HIDDEN),
                  w_spec((HIDDEN, IN_FEATURES))],
        out_specs=[act_spec(IN_FEATURES), smem_spec],
        out_shape=[jax.ShapeDtypeStruct((b_pad, IN_FEATURES), jnp.float32),
                   stats_shape],
        compiler_params=reduce_params,
    )(stats2, bn[2:4], h2, w3)

    # Layer 4: BN3 (scale only; shift cancels under softmax) + softmax(dim=2).
    out_pad = pl.pallas_call(
        functools.partial(_bn_softmax_kernel, n_prev=B * IN_FEATURES),
        grid=(num_tiles,),
        in_specs=[smem_spec, smem_spec, act_spec(IN_FEATURES)],
        out_specs=act_spec(IN_FEATURES),
        out_shape=jax.ShapeDtypeStruct((b_pad, IN_FEATURES), jnp.float32),
        compiler_params=parallel_params,
    )(stats3, bn[4:6], h3)

    return out_pad[:B].reshape(B, 1, IN_FEATURES)


# ---------------------------------------------------------------------------
# Parameter init and pure-JAX reference
# ---------------------------------------------------------------------------
def _init_params(key):
    """Deterministic parameter init (PyTorch-style kaiming-uniform bounds)."""
    k1, k2, k3 = jax.random.split(key, 3)

    def linear_w(k, fan_in, fan_out):
        bound = 1.0 / (fan_in ** 0.5)
        # stored transposed: (in, out) so the kernels compute x @ W
        return jax.random.uniform(k, (fan_in, fan_out), jnp.float32,
                                  -bound, bound)

    w1 = linear_w(k1, IN_FEATURES, HIDDEN)   # input_layer.weight^T
    w2 = linear_w(k2, HIDDEN, HIDDEN)        # hidden_layer.weight^T
    w3 = linear_w(k3, HIDDEN, IN_FEATURES)   # output_layer.weight^T

    # BatchNorm1d(1) default init: gamma=1, beta=0 per layer.
    bn_params = jnp.array([1.0, 0.0, 1.0, 0.0, 1.0, 0.0], dtype=jnp.float32)
    return w1, w2, w3, bn_params


def _reference(x, w1, w2, w3, bn_params):
    """Pure-JAX reference of the same forward pass (training-mode BN)."""
    B = x.shape[0]
    h = x.reshape(B, IN_FEATURES)

    def bn(h, g, b):
        mean = jnp.mean(h)
        var = jnp.mean((h - mean) ** 2)
        return (h - mean) / jnp.sqrt(var + BN_EPS) * g + b

    h = jnp.maximum(bn(h @ w1, bn_params[0], bn_params[1]), 0.0)
    h = jnp.maximum(bn(h @ w2, bn_params[2], bn_params[3]), 0.0)
    h = bn(h @ w3, bn_params[4], bn_params[5])
    return jax.nn.softmax(h, axis=-1).reshape(B, 1, IN_FEATURES)


if __name__ == "__main__":
    key = jax.random.PRNGKey(0)
    k_x, k_p = jax.random.split(key)

    B = 40   # small batch; deliberately NOT a multiple of the tile size
    x = jax.random.normal(k_x, (B, 1, IN_FEATURES), dtype=jnp.float32)
    w1, w2, w3, bn_params = _init_params(k_p)
    ref = _reference(x, w1, w2, w3, bn_params)

    # Small tile so the test exercises multi-tile grids, cross-tile BN-stat
    # accumulation and padded-row masking (40 -> padded to 48, 3 tiles).
    out_fused = jax.block_until_ready(
        model_forward(x, w1, w2, w3, bn_params, tile_b=16))
    out_tiled = jax.block_until_ready(
        model_forward(x, w1, w2, w3, bn_params, tile_b=16, force_tiled=True))

    for out in (out_fused, out_tiled):
        assert out.shape == (B, 1, IN_FEATURES)
        err = float(jnp.max(jnp.abs(out - ref)))
        assert err < 3e-3, err
        assert jnp.allclose(jnp.sum(out, axis=2), 1.0, atol=1e-3)

    print("KERNEL_OK")
</pallas_src>

<mosaic_0001>
module attributes {stable_mosaic.version = 11 : i64} {
  func.func @_fused_kernel(%arg0: i32, %arg1: i32, %arg2: memref<16x9xf32, #tpu.memory_space<vmem>>, %arg3: memref<9x100xf32, #tpu.memory_space<vmem>>, %arg4: memref<100x100xf32, #tpu.memory_space<vmem>>, %arg5: memref<100x9xf32, #tpu.memory_space<vmem>>, %arg6: memref<6xf32, #tpu.memory_space<smem>>, %arg7: memref<16x9xf32, #tpu.memory_space<vmem>>, %arg8: memref<48x100xf32, #tpu.memory_space<vmem>>, %arg9: memref<48x9xf32, #tpu.memory_space<vmem>>, %arg10: memref<6xf32, #tpu.memory_space<smem>>) attributes {dimension_semantics = [#tpu.dimension_semantics<arbitrary>, #tpu.dimension_semantics<arbitrary>], iteration_bounds = array<i64: 4, 3>, scalar_prefetch = 0 : i64, scratch_operands = 3 : i64, tpu.core_type = #tpu.core_type<tc>, window_params = [{transform_indices = @transform_0, window_bounds = array<i64: 16, 9>}, {pipeline_mode = #tpu.pipeline_mode<synchronous>, transform_indices = @transform_1, window_bounds = array<i64: 9, 100>}, {pipeline_mode = #tpu.pipeline_mode<synchronous>, transform_indices = @transform_2, window_bounds = array<i64: 100, 100>}, {pipeline_mode = #tpu.pipeline_mode<synchronous>, transform_indices = @transform_3, window_bounds = array<i64: 100, 9>}, {transform_indices = @transform_4, window_bounds = array<i64: 6>}, {transform_indices = @transform_5, window_bounds = array<i64: 16, 9>}]} {
    %c0_i32 = arith.constant 0 : i32
    %0 = arith.cmpi eq, %arg0, %c0_i32 : i32
    %c0_i32_0 = arith.constant 0 : i32
    %1 = arith.cmpi eq, %arg1, %c0_i32_0 : i32
    %2 = arith.andi %0, %1 : i1
    %3 = arith.extui %2 : i1 to i32
    %c0_i32_1 = arith.constant 0 : i32
    %4 = arith.cmpi ne, %3, %c0_i32_1 : i32
    scf.if %4 {
      %cst = arith.constant 0.000000e+00 : f32
      %c0 = arith.constant 0 : index
      %22 = memref.load %arg10[%c0] : memref<6xf32, #tpu.memory_space<smem>>
      memref.store %cst, %arg10[%c0] : memref<6xf32, #tpu.memory_space<smem>>
      %cst_9 = arith.constant 0.000000e+00 : f32
      %c1 = arith.constant 1 : index
      %23 = memref.load %arg10[%c1] : memref<6xf32, #tpu.memory_space<smem>>
      memref.store %cst_9, %arg10[%c1] : memref<6xf32, #tpu.memory_space<smem>>
      %cst_10 = arith.constant 0.000000e+00 : f32
      %c2 = arith.constant 2 : index
      %24 = memref.load %arg10[%c2] : memref<6xf32, #tpu.memory_space<smem>>
      memref.store %cst_10, %arg10[%c2] : memref<6xf32, #tpu.memory_space<smem>>
      %cst_11 = arith.constant 0.000000e+00 : f32
      %c3 = arith.constant 3 : index
      %25 = memref.load %arg10[%c3] : memref<6xf32, #tpu.memory_space<smem>>
      memref.store %cst_11, %arg10[%c3] : memref<6xf32, #tpu.memory_space<smem>>
      %cst_12 = arith.constant 0.000000e+00 : f32
      %c4 = arith.constant 4 : index
      %26 = memref.load %arg10[%c4] : memref<6xf32, #tpu.memory_space<smem>>
      memref.store %cst_12, %arg10[%c4] : memref<6xf32, #tpu.memory_space<smem>>
      %cst_13 = arith.constant 0.000000e+00 : f32
      %c5 = arith.constant 5 : index
      %27 = memref.load %arg10[%c5] : memref<6xf32, #tpu.memory_space<smem>>
      memref.store %cst_13, %arg10[%c5] : memref<6xf32, #tpu.memory_space<smem>>
    } else {
    }
    %c16_i32 = arith.constant 16 : i32
    %5 = arith.muli %arg1, %c16_i32 : i32
    %6 = tpu.assume_multiple %5, 8 : i32
    %c0_i32_2 = arith.constant 0 : i32
    %7 = arith.cmpi eq, %arg0, %c0_i32_2 : i32
    %8 = arith.extui %7 : i1 to i32
    %c0_i32_3 = arith.constant 0 : i32
    %9 = arith.cmpi ne, %8, %c0_i32_3 : i32
    scf.if %9 {
      %c0 = arith.constant 0 : index
      %c0_9 = arith.constant 0 : index
      %22 = vector.load %arg2[%c0, %c0_9] : memref<16x9xf32, #tpu.memory_space<vmem>>, vector<16x9xf32>
      %c0_10 = arith.constant 0 : index
      %c0_11 = arith.constant 0 : index
      %23 = vector.load %arg3[%c0_10, %c0_11] : memref<9x100xf32, #tpu.memory_space<vmem>>, vector<9x100xf32>
      %cst = arith.constant dense<0.000000e+00> : vector<16x100xf32>
      %24 = tpu.matmul %22, %23, %cst {dimension_numbers = #tpu.dot_dimension_numbers<[1], [0], [0], [1], [0, 0, 1, 1], [], []>} : vector<16x9xf32>, vector<9x100xf32>, vector<16x100xf32> -> vector<16x100xf32>
      %25 = arith.index_cast %6 : i32 to index
      %c0_12 = arith.constant 0 : index
      %26 = vector.load %arg8[%25, %c0_12] : memref<48x100xf32, #tpu.memory_space<vmem>>, vector<16x100xf32>
      tpu.vector_store %arg8[%25, %c0_12], %24 {strides = array<i32>} : memref<48x100xf32, #tpu.memory_space<vmem>>, vector<16x100xf32>,
      %c2_i32_13 = arith.constant 2 : i32
      %27 = arith.cmpi eq, %arg1, %c2_i32_13 : i32
      %28 = arith.extui %27 : i1 to i32
      %c0_i32_14 = arith.constant 0 : i32
      %29 = arith.cmpi ne, %28, %c0_i32_14 : i32
      scf.if %29 {
        %33 = tpu.iota {dimensions = array<i32: 0>} : vector<16x1xi32>
        %c16_i32_17 = arith.constant 16 : i32
        %34 = arith.muli %arg1, %c16_i32_17 : i32
        %35 = vector.broadcast %34 : i32 to vector<16x1xi32>
        %36 = arith.addi %33, %35 : vector<16x1xi32>
        %c40_i32 = arith.constant 40 : i32
        %37 = vector.broadcast %c40_i32 : i32 to vector<16x1xi32>
        %38 = arith.cmpi slt, %36, %37 : vector<16x1xi32>
        %cst_18 = arith.constant 0.000000e+00 : f32
        %39 = vector.shape_cast %38 : vector<16x1xi1> to vector<16x1xi1>
        %40 = vector.broadcast %39 : vector<16x1xi1> to vector<16x100xi1>
        %41 = vector.broadcast %cst_18 : f32 to vector<16x100xf32>
        %42 = arith.select %40, %24, %41 : vector<16x100xi1>, vector<16x100xf32>
        %c0_19 = arith.constant 0 : index
        %43 = memref.load %arg10[%c0_19] : memref<6xf32, #tpu.memory_space<smem>>
        %44 = vector.shape_cast %42 : vector<16x100xf32> to vector<1x16x100xf32>
        %cst_20 = arith.constant dense<0.000000e+00> : vector<1xf32>
        %45 = vector.multi_reduction <add>, %44, %cst_20 [1, 2] : vector<1x16x100xf32> to vector<1xf32>
        %46 = vector.shape_cast %45 : vector<1xf32> to vector<1x1x1xf32>
        %47 = vector.extract %46[0, 0, 0] : f32 from vector<1x1x1xf32>
        %48 = arith.addf %43, %47 : f32
        %c0_21 = arith.constant 0 : index
        %49 = memref.load %arg10[%c0_21] : memref<6xf32, #tpu.memory_space<smem>>
        memref.store %48, %arg10[%c0_21] : memref<6xf32, #tpu.memory_space<smem>>
        %c1 = arith.constant 1 : index
        %50 = memref.load %arg10[%c1] : memref<6xf32, #tpu.memory_space<smem>>
        %51 = arith.mulf %42, %42 : vector<16x100xf32>
        %52 = vector.shape_cast %51 : vector<16x100xf32> to vector<1x16x100xf32>
        %cst_22 = arith.constant dense<0.000000e+00> : vector<1xf32>
        %53 = vector.multi_reduction <add>, %52, %cst_22 [1, 2] : vector<1x16x100xf32> to vector<1xf32>
        %54 = vector.shape_cast %53 : vector<1xf32> to vector<1x1x1xf32>
        %55 = vector.extract %54[0, 0, 0] : f32 from vector<1x1x1xf32>
        %56 = arith.addf %50, %55 : f32
        %c1_23 = arith.constant 1 : index
        %57 = memref.load %arg10[%c1_23] : memref<6xf32, #tpu.memory_space<smem>>
        memref.store %56, %arg10[%c1_23] : memref<6xf32, #tpu.memory_space<smem>>
      } else {
      }
      %c2_i32_15 = arith.constant 2 : i32
      %30 = arith.cmpi ne, %arg1, %c2_i32_15 : i32
      %31 = arith.extui %30 : i1 to i32
      %c0_i32_16 = arith.constant 0 : i32
      %32 = arith.cmpi ne, %31, %c0_i32_16 : i32
      scf.if %32 {
        %c0_17 = arith.constant 0 : index
        %33 = memref.load %arg10[%c0_17] : memref<6xf32, #tpu.memory_space<smem>>
        %34 = vector.shape_cast %24 : vector<16x100xf32> to vector<1x16x100xf32>
        %cst_18 = arith.constant dense<0.000000e+00> : vector<1xf32>
        %35 = vector.multi_reduction <add>, %34, %cst_18 [1, 2] : vector<1x16x100xf32> to vector<1xf32>
        %36 = vector.shape_cast %35 : vector<1xf32> to vector<1x1x1xf32>
        %37 = vector.extract %36[0, 0, 0] : f32 from vector<1x1x1xf32>
        %38 = arith.addf %33, %37 : f32
        %c0_19 = arith.constant 0 : index
        %39 = memref.load %arg10[%c0_19] : memref<6xf32, #tpu.memory_space<smem>>
        memref.store %38, %arg10[%c0_19] : memref<6xf32, #tpu.memory_space<smem>>
        %c1 = arith.constant 1 : index
        %40 = memref.load %arg10[%c1] : memref<6xf32, #tpu.memory_space<smem>>
        %41 = arith.mulf %24, %24 : vector<16x100xf32>
        %42 = vector.shape_cast %41 : vector<16x100xf32> to vector<1x16x100xf32>
        %cst_20 = arith.constant dense<0.000000e+00> : vector<1xf32>
        %43 = vector.multi_reduction <add>, %42, %cst_20 [1, 2] : vector<1x16x100xf32> to vector<1xf32>
        %44 = vector.shape_cast %43 : vector<1xf32> to vector<1x1x1xf32>
        %45 = vector.extract %44[0, 0, 0] : f32 from vector<1x1x1xf32>
        %46 = arith.addf %40, %45 : f32
        %c1_21 = arith.constant 1 : index
        %47 = memref.load %arg10[%c1_21] : memref<6xf32, #tpu.memory_space<smem>>
        memref.store %46, %arg10[%c1_21] : memref<6xf32, #tpu.memory_space<smem>>
      } else {
      }
    } else {
    }
    %c1_i32 = arith.constant 1 : i32
    %10 = arith.cmpi eq, %arg0, %c1_i32 : i32
    %11 = arith.extui %10 : i1 to i32
    %c0_i32_4 = arith.constant 0 : i32
    %12 = arith.cmpi ne, %11, %c0_i32_4 : i32
    scf.if %12 {
      %c0 = arith.constant 0 : index
      %22 = memref.load %arg10[%c0] : memref<6xf32, #tpu.memory_space<smem>>
      %c1 = arith.constant 1 : index
      %23 = memref.load %arg10[%c1] : memref<6xf32, #tpu.memory_space<smem>>
      %c0_9 = arith.constant 0 : index
      %24 = memref.load %arg6[%c0_9] : memref<6xf32, #tpu.memory_space<smem>>
      %c1_10 = arith.constant 1 : index
      %25 = memref.load %arg6[%c1_10] : memref<6xf32, #tpu.memory_space<smem>>
      %cst = arith.constant 2.500000e-04 : f32
      %26 = arith.mulf %22, %cst : f32
      %cst_11 = arith.constant 2.500000e-04 : f32
      %27 = arith.mulf %23, %cst_11 : f32
      %28 = arith.mulf %26, %26 : f32
      %29 = arith.subf %27, %28 : f32
      %cst_12 = arith.constant 9.99999974E-6 : f32
      %30 = arith.addf %29, %cst_12 : f32
      %31 = math.rsqrt %30 : f32
      %32 = arith.mulf %24, %31 : f32
      %33 = arith.mulf %26, %32 : f32
      %34 = arith.subf %25, %33 : f32
      %35 = arith.index_cast %6 : i32 to index
      %c0_13 = arith.constant 0 : index
      %36 = vector.load %arg8[%35, %c0_13] : memref<48x100xf32, #tpu.memory_space<vmem>>, vector<16x100xf32>
      %37 = vector.broadcast %32 : f32 to vector<16x100xf32>
      %38 = arith.mulf %36, %37 : vector<16x100xf32>
      %39 = vector.broadcast %34 : f32 to vector<16x100xf32>
      %40 = arith.addf %38, %39 : vector<16x100xf32>
      %cst_14 = arith.constant 0.000000e+00 : f32
      %41 = vector.broadcast %cst_14 : f32 to vector<16x100xf32>
      %42 = arith.maximumf %40, %41 : vector<16x100xf32>
      %c0_15 = arith.constant 0 : index
      %c0_16 = arith.constant 0 : index
      %43 = vector.load %arg4[%c0_15, %c0_16] : memref<100x100xf32, #tpu.memory_space<vmem>>, vector<100x100xf32>
      %cst_17 = arith.constant dense<0.000000e+00> : vector<16x100xf32>
      %44 = tpu.matmul %42, %43, %cst_17 {dimension_numbers = #tpu.dot_dimension_numbers<[1], [0], [0], [1], [0, 0, 1, 1], [], []>} : vector<16x100xf32>, vector<100x100xf32>, vector<16x100xf32> -> vector<16x100xf32>
      %45 = arith.index_cast %6 : i32 to index
      %c0_18 = arith.constant 0 : index
      %46 = vector.load %arg8[%45, %c0_18] : memref<48x100xf32, #tpu.memory_space<vmem>>, vector<16x100xf32>
      tpu.vector_store %arg8[%45, %c0_18], %44 {strides = array<i32>} : memref<48x100xf32, #tpu.memory_space<vmem>>, vector<16x100xf32>,
      %c2_i32_19 = arith.constant 2 : i32
      %47 = arith.cmpi eq, %arg1, %c2_i32_19 : i32
      %48 = arith.extui %47 : i1 to i32
      %c0_i32_20 = arith.constant 0 : i32
      %49 = arith.cmpi ne, %48, %c0_i32_20 : i32
      scf.if %49 {
        %53 = tpu.iota {dimensions = array<i32: 0>} : vector<16x1xi32>
        %c16_i32_23 = arith.constant 16 : i32
        %54 = arith.muli %arg1, %c16_i32_23 : i32
        %55 = vector.broadcast %54 : i32 to vector<16x1xi32>
        %56 = arith.addi %53, %55 : vector<16x1xi32>
        %c40_i32 = arith.constant 40 : i32
        %57 = vector.broadcast %c40_i32 : i32 to vector<16x1xi32>
        %58 = arith.cmpi slt, %56, %57 : vector<16x1xi32>
        %cst_24 = arith.constant 0.000000e+00 : f32
        %59 = vector.shape_cast %58 : vector<16x1xi1> to vector<16x1xi1>
        %60 = vector.broadcast %59 : vector<16x1xi1> to vector<16x100xi1>
        %61 = vector.broadcast %cst_24 : f32 to vector<16x100xf32>
        %62 = arith.select %60, %44, %61 : vector<16x100xi1>, vector<16x100xf32>
        %c2 = arith.constant 2 : index
        %63 = memref.load %arg10[%c2] : memref<6xf32, #tpu.memory_space<smem>>
        %64 = vector.shape_cast %62 : vector<16x100xf32> to vector<1x16x100xf32>
        %cst_25 = arith.constant dense<0.000000e+00> : vector<1xf32>
        %65 = vector.multi_reduction <add>, %64, %cst_25 [1, 2] : vector<1x16x100xf32> to vector<1xf32>
        %66 = vector.shape_cast %65 : vector<1xf32> to vector<1x1x1xf32>
        %67 = vector.extract %66[0, 0, 0] : f32 from vector<1x1x1xf32>
        %68 = arith.addf %63, %67 : f32
        %c2_26 = arith.constant 2 : index
        %69 = memref.load %arg10[%c2_26] : memref<6xf32, #tpu.memory_space<smem>>
        memref.store %68, %arg10[%c2_26] : memref<6xf32, #tpu.memory_space<smem>>
        %c3 = arith.constant 3 : index
        %70 = memref.load %arg10[%c3] : memref<6xf32, #tpu.memory_space<smem>>
        %71 = arith.mulf %62, %62 : vector<16x100xf32>
        %72 = vector.shape_cast %71 : vector<16x100xf32> to vector<1x16x100xf32>
        %cst_27 = arith.constant dense<0.000000e+00> : vector<1xf32>
        %73 = vector.multi_reduction <add>, %72, %cst_27 [1, 2] : vector<1x16x100xf32> to vector<1xf32>
        %74 = vector.shape_cast %73 : vector<1xf32> to vector<1x1x1xf32>
        %75 = vector.extract %74[0, 0, 0] : f32 from vector<1x1x1xf32>
        %76 = arith.addf %70, %75 : f32
        %c3_28 = arith.constant 3 : index
        %77 = memref.load %arg10[%c3_28] : memref<6xf32, #tpu.memory_space<smem>>
        memref.store %76, %arg10[%c3_28] : memref<6xf32, #tpu.memory_space<smem>>
      } else {
      }
      %c2_i32_21 = arith.constant 2 : i32
      %50 = arith.cmpi ne, %arg1, %c2_i32_21 : i32
      %51 = arith.extui %50 : i1 to i32
      %c0_i32_22 = arith.constant 0 : i32
      %52 = arith.cmpi ne, %51, %c0_i32_22 : i32
      scf.if %52 {
        %c2 = arith.constant 2 : index
        %53 = memref.load %arg10[%c2] : memref<6xf32, #tpu.memory_space<smem>>
        %54 = vector.shape_cast %44 : vector<16x100xf32> to vector<1x16x100xf32>
        %cst_23 = arith.constant dense<0.000000e+00> : vector<1xf32>
        %55 = vector.multi_reduction <add>, %54, %cst_23 [1, 2] : vector<1x16x100xf32> to vector<1xf32>
        %56 = vector.shape_cast %55 : vector<1xf32> to vector<1x1x1xf32>
        %57 = vector.extract %56[0, 0, 0] : f32 from vector<1x1x1xf32>
        %58 = arith.addf %53, %57 : f32
        %c2_24 = arith.constant 2 : index
        %59 = memref.load %arg10[%c2_24] : memref<6xf32, #tpu.memory_space<smem>>
        memref.store %58, %arg10[%c2_24] : memref<6xf32, #tpu.memory_space<smem>>
        %c3 = arith.constant 3 : index
        %60 = memref.load %arg10[%c3] : memref<6xf32, #tpu.memory_space<smem>>
        %61 = arith.mulf %44, %44 : vector<16x100xf32>
        %62 = vector.shape_cast %61 : vector<16x100xf32> to vector<1x16x100xf32>
        %cst_25 = arith.constant dense<0.000000e+00> : vector<1xf32>
        %63 = vector.multi_reduction <add>, %62, %cst_25 [1, 2] : vector<1x16x100xf32> to vector<1xf32>
        %64 = vector.shape_cast %63 : vector<1xf32> to vector<1x1x1xf32>
        %65 = vector.extract %64[0, 0, 0] : f32 from vector<1x1x1xf32>
        %66 = arith.addf %60, %65 : f32
        %c3_26 = arith.constant 3 : index
        %67 = memref.load %arg10[%c3_26] : memref<6xf32, #tpu.memory_space<smem>>
        memref.store %66, %arg10[%c3_26] : memref<6xf32, #tpu.memory_space<smem>>
      } else {
      }
    } else {
    }
    %c2_i32 = arith.constant 2 : i32
    %13 = arith.cmpi eq, %arg0, %c2_i32 : i32
    %14 = arith.extui %13 : i1 to i32
    %c0_i32_5 = arith.constant 0 : i32
    %15 = arith.cmpi ne, %14, %c0_i32_5 : i32
    scf.if %15 {
      %c2 = arith.constant 2 : index
      %22 = memref.load %arg10[%c2] : memref<6xf32, #tpu.memory_space<smem>>
      %c3 = arith.constant 3 : index
      %23 = memref.load %arg10[%c3] : memref<6xf32, #tpu.memory_space<smem>>
      %c2_9 = arith.constant 2 : index
      %24 = memref.load %arg6[%c2_9] : memref<6xf32, #tpu.memory_space<smem>>
      %c3_10 = arith.constant 3 : index
      %25 = memref.load %arg6[%c3_10] : memref<6xf32, #tpu.memory_space<smem>>
      %cst = arith.constant 2.500000e-04 : f32
      %26 = arith.mulf %22, %cst : f32
      %cst_11 = arith.constant 2.500000e-04 : f32
      %27 = arith.mulf %23, %cst_11 : f32
      %28 = arith.mulf %26, %26 : f32
      %29 = arith.subf %27, %28 : f32
      %cst_12 = arith.constant 9.99999974E-6 : f32
      %30 = arith.addf %29, %cst_12 : f32
      %31 = math.rsqrt %30 : f32
      %32 = arith.mulf %24, %31 : f32
      %33 = arith.mulf %26, %32 : f32
      %34 = arith.subf %25, %33 : f32
      %35 = arith.index_cast %6 : i32 to index
      %c0 = arith.constant 0 : index
      %36 = vector.load %arg8[%35, %c0] : memref<48x100xf32, #tpu.memory_space<vmem>>, vector<16x100xf32>
      %37 = vector.broadcast %32 : f32 to vector<16x100xf32>
      %38 = arith.mulf %36, %37 : vector<16x100xf32>
      %39 = vector.broadcast %34 : f32 to vector<16x100xf32>
      %40 = arith.addf %38, %39 : vector<16x100xf32>
      %cst_13 = arith.constant 0.000000e+00 : f32
      %41 = vector.broadcast %cst_13 : f32 to vector<16x100xf32>
      %42 = arith.maximumf %40, %41 : vector<16x100xf32>
      %c0_14 = arith.constant 0 : index
      %c0_15 = arith.constant 0 : index
      %43 = vector.load %arg5[%c0_14, %c0_15] : memref<100x9xf32, #tpu.memory_space<vmem>>, vector<100x9xf32>
      %cst_16 = arith.constant dense<0.000000e+00> : vector<16x9xf32>
      %44 = tpu.matmul %42, %43, %cst_16 {dimension_numbers = #tpu.dot_dimension_numbers<[1], [0], [0], [1], [0, 0, 1, 1], [], []>} : vector<16x100xf32>, vector<100x9xf32>, vector<16x9xf32> -> vector<16x9xf32>
      %45 = arith.index_cast %6 : i32 to index
      %c0_17 = arith.constant 0 : index
      %46 = vector.load %arg9[%45, %c0_17] : memref<48x9xf32, #tpu.memory_space<vmem>>, vector<16x9xf32>
      tpu.vector_store %arg9[%45, %c0_17], %44 {strides = array<i32>} : memref<48x9xf32, #tpu.memory_space<vmem>>, vector<16x9xf32>,
      %c2_i32_18 = arith.constant 2 : i32
      %47 = arith.cmpi eq, %arg1, %c2_i32_18 : i32
      %48 = arith.extui %47 : i1 to i32
      %c0_i32_19 = arith.constant 0 : i32
      %49 = arith.cmpi ne, %48, %c0_i32_19 : i32
      scf.if %49 {
        %53 = tpu.iota {dimensions = array<i32: 0>} : vector<16x1xi32>
        %c16_i32_22 = arith.constant 16 : i32
        %54 = arith.muli %arg1, %c16_i32_22 : i32
        %55 = vector.broadcast %54 : i32 to vector<16x1xi32>
        %56 = arith.addi %53, %55 : vector<16x1xi32>
        %c40_i32 = arith.constant 40 : i32
        %57 = vector.broadcast %c40_i32 : i32 to vector<16x1xi32>
        %58 = arith.cmpi slt, %56, %57 : vector<16x1xi32>
        %cst_23 = arith.constant 0.000000e+00 : f32
        %59 = vector.shape_cast %58 : vector<16x1xi1> to vector<16x1xi1>
        %60 = vector.broadcast %59 : vector<16x1xi1> to vector<16x9xi1>
        %61 = vector.broadcast %cst_23 : f32 to vector<16x9xf32>
        %62 = arith.select %60, %44, %61 : vector<16x9xi1>, vector<16x9xf32>
        %c4 = arith.constant 4 : index
        %63 = memref.load %arg10[%c4] : memref<6xf32, #tpu.memory_space<smem>>
        %64 = vector.shape_cast %62 : vector<16x9xf32> to vector<1x16x9xf32>
        %cst_24 = arith.constant dense<0.000000e+00> : vector<1xf32>
        %65 = vector.multi_reduction <add>, %64, %cst_24 [1, 2] : vector<1x16x9xf32> to vector<1xf32>
        %66 = vector.shape_cast %65 : vector<1xf32> to vector<1x1x1xf32>
        %67 = vector.extract %66[0, 0, 0] : f32 from vector<1x1x1xf32>
        %68 = arith.addf %63, %67 : f32
        %c4_25 = arith.constant 4 : index
        %69 = memref.load %arg10[%c4_25] : memref<6xf32, #tpu.memory_space<smem>>
        memref.store %68, %arg10[%c4_25] : memref<6xf32, #tpu.memory_space<smem>>
        %c5 = arith.constant 5 : index
        %70 = memref.load %arg10[%c5] : memref<6xf32, #tpu.memory_space<smem>>
        %71 = arith.mulf %62, %62 : vector<16x9xf32>
        %72 = vector.shape_cast %71 : vector<16x9xf32> to vector<1x16x9xf32>
        %cst_26 = arith.constant dense<0.000000e+00> : vector<1xf32>
        %73 = vector.multi_reduction <add>, %72, %cst_26 [1, 2] : vector<1x16x9xf32> to vector<1xf32>
        %74 = vector.shape_cast %73 : vector<1xf32> to vector<1x1x1xf32>
        %75 = vector.extract %74[0, 0, 0] : f32 from vector<1x1x1xf32>
        %76 = arith.addf %70, %75 : f32
        %c5_27 = arith.constant 5 : index
        %77 = memref.load %arg10[%c5_27] : memref<6xf32, #tpu.memory_space<smem>>
        memref.store %76, %arg10[%c5_27] : memref<6xf32, #tpu.memory_space<smem>>
      } else {
      }
      %c2_i32_20 = arith.constant 2 : i32
      %50 = arith.cmpi ne, %arg1, %c2_i32_20 : i32
      %51 = arith.extui %50 : i1 to i32
      %c0_i32_21 = arith.constant 0 : i32
      %52 = arith.cmpi ne, %51, %c0_i32_21 : i32
      scf.if %52 {
        %c4 = arith.constant 4 : index
        %53 = memref.load %arg10[%c4] : memref<6xf32, #tpu.memory_space<smem>>
        %54 = vector.shape_cast %44 : vector<16x9xf32> to vector<1x16x9xf32>
        %cst_22 = arith.constant dense<0.000000e+00> : vector<1xf32>
        %55 = vector.multi_reduction <add>, %54, %cst_22 [1, 2] : vector<1x16x9xf32> to vector<1xf32>
        %56 = vector.shape_cast %55 : vector<1xf32> to vector<1x1x1xf32>
        %57 = vector.extract %56[0, 0, 0] : f32 from vector<1x1x1xf32>
        %58 = arith.addf %53, %57 : f32
        %c4_23 = arith.constant 4 : index
        %59 = memref.load %arg10[%c4_23] : memref<6xf32, #tpu.memory_space<smem>>
        memref.store %58, %arg10[%c4_23] : memref<6xf32, #tpu.memory_space<smem>>
        %c5 = arith.constant 5 : index
        %60 = memref.load %arg10[%c5] : memref<6xf32, #tpu.memory_space<smem>>
        %61 = arith.mulf %44, %44 : vector<16x9xf32>
        %62 = vector.shape_cast %61 : vector<16x9xf32> to vector<1x16x9xf32>
        %cst_24 = arith.constant dense<0.000000e+00> : vector<1xf32>
        %63 = vector.multi_reduction <add>, %62, %cst_24 [1, 2] : vector<1x16x9xf32> to vector<1xf32>
        %64 = vector.shape_cast %63 : vector<1xf32> to vector<1x1x1xf32>
        %65 = vector.extract %64[0, 0, 0] : f32 from vector<1x1x1xf32>
        %66 = arith.addf %60, %65 : f32
        %c5_25 = arith.constant 5 : index
        %67 = memref.load %arg10[%c5_25] : memref<6xf32, #tpu.memory_space<smem>>
        memref.store %66, %arg10[%c5_25] : memref<6xf32, #tpu.memory_space<smem>>
      } else {
      }
    } else {
    }
    %c3_i32 = arith.constant 3 : i32
    %16 = arith.cmpi eq, %arg0, %c3_i32 : i32
    %17 = arith.extui %16 : i1 to i32
    %c0_i32_6 = arith.constant 0 : i32
    %18 = arith.cmpi ne, %17, %c0_i32_6 : i32
    scf.if %18 {
      %c4 = arith.constant 4 : index
      %22 = memref.load %arg10[%c4] : memref<6xf32, #tpu.memory_space<smem>>
      %c5 = arith.constant 5 : index
      %23 = memref.load %arg10[%c5] : memref<6xf32, #tpu.memory_space<smem>>
      %c4_9 = arith.constant 4 : index
      %24 = memref.load %arg6[%c4_9] : memref<6xf32, #tpu.memory_space<smem>>
      %cst = arith.constant 0.00277777785 : f32
      %25 = arith.mulf %22, %cst : f32
      %cst_10 = arith.constant 0.00277777785 : f32
      %26 = arith.mulf %23, %cst_10 : f32
      %27 = arith.mulf %25, %25 : f32
      %28 = arith.subf %26, %27 : f32
      %cst_11 = arith.constant 9.99999974E-6 : f32
      %29 = arith.addf %28, %cst_11 : f32
      %30 = math.rsqrt %29 : f32
      %31 = arith.mulf %24, %30 : f32
      %32 = arith.index_cast %6 : i32 to index
      %c0 = arith.constant 0 : index
      %33 = vector.load %arg9[%32, %c0] : memref<48x9xf32, #tpu.memory_space<vmem>>, vector<16x9xf32>
      %34 = vector.broadcast %31 : f32 to vector<16x9xf32>
      %35 = arith.mulf %33, %34 : vector<16x9xf32>
      %cst_12 = arith.constant dense<0xFF800000> : vector<16xf32>
      %36 = vector.multi_reduction <maximumf>, %35, %cst_12 [1] : vector<16x9xf32> to vector<16xf32>
      %37 = vector.shape_cast %36 : vector<16xf32> to vector<16x1xf32>
      %38 = vector.broadcast %37 : vector<16x1xf32> to vector<16x9xf32>
      %39 = arith.subf %35, %38 : vector<16x9xf32>
      %40 = math.exp %39 : vector<16x9xf32>
      %cst_13 = arith.constant dense<0.000000e+00> : vector<16xf32>
      %41 = vector.multi_reduction <add>, %40, %cst_13 [1] : vector<16x9xf32> to vector<16xf32>
      %42 = vector.shape_cast %41 : vector<16xf32> to vector<16x1xf32>
      %43 = vector.broadcast %42 : vector<16x1xf32> to vector<16x9xf32>
      %44 = arith.divf %40, %43 : vector<16x9xf32>
      %c0_14 = arith.constant 0 : index
      %c0_15 = arith.constant 0 : index
      %45 = vector.load %arg7[%c0_14, %c0_15] : memref<16x9xf32, #tpu.memory_space<vmem>>, vector<16x9xf32>
      tpu.vector_store %arg7[%c0_14, %c0_15], %44 {strides = array<i32>} : memref<16x9xf32, #tpu.memory_space<vmem>>, vector<16x9xf32>,
    } else {
    }
    %c3_i32_7 = arith.constant 3 : i32
    %19 = arith.cmpi ne, %arg0, %c3_i32_7 : i32
    %20 = arith.extui %19 : i1 to i32
    %c0_i32_8 = arith.constant 0 : i32
    %21 = arith.cmpi ne, %20, %c0_i32_8 : i32
    scf.if %21 {
      %cst = arith.constant 0.000000e+00 : f32
      %22 = vector.broadcast %cst : f32 to vector<16x9xf32>
      %c0 = arith.constant 0 : index
      %c0_9 = arith.constant 0 : index
      %23 = vector.load %arg7[%c0, %c0_9] : memref<16x9xf32, #tpu.memory_space<vmem>>, vector<16x9xf32>
      tpu.vector_store %arg7[%c0, %c0_9], %22 {strides = array<i32>} : memref<16x9xf32, #tpu.memory_space<vmem>>, vector<16x9xf32>,
    } else {
    }
    return
  }
  func.func @transform_0(%arg0: i32, %arg1: i32) -> (i32, i32) {
    %c0_i32 = arith.constant 0 : i32
    %c0_i32_0 = arith.constant 0 : i32
    return %arg1, %c0_i32 : i32, i32
  }
  func.func @transform_1(%arg0: i32, %arg1: i32) -> (i32, i32) {
    %c0_i32 = arith.constant 0 : i32
    %c0_i32_0 = arith.constant 0 : i32
    %c0_i32_1 = arith.constant 0 : i32
    return %c0_i32, %c0_i32_0 : i32, i32
  }
  func.func @transform_2(%arg0: i32, %arg1: i32) -> (i32, i32) {
    %c0_i32 = arith.constant 0 : i32
    %c0_i32_0 = arith.constant 0 : i32
    %c0_i32_1 = arith.constant 0 : i32
    return %c0_i32, %c0_i32_0 : i32, i32
  }
  func.func @transform_3(%arg0: i32, %arg1: i32) -> (i32, i32) {
    %c0_i32 = arith.constant 0 : i32
    %c0_i32_0 = arith.constant 0 : i32
    %c0_i32_1 = arith.constant 0 : i32
    return %c0_i32, %c0_i32_0 : i32, i32
  }
  func.func @transform_4(%arg0: i32, %arg1: i32) -> i32 {
    %c0_i32 = arith.constant 0 : i32
    %c0_i32_0 = arith.constant 0 : i32
    return %c0_i32 : i32
  }
  func.func @transform_5(%arg0: i32, %arg1: i32) -> (i32, i32) {
    %c0_i32 = arith.constant 0 : i32
    %c0_i32_0 = arith.constant 0 : i32
    return %arg1, %c0_i32 : i32, i32
  }
}

</mosaic_0001>

<bundles_post_ra>
// kernel: tpu_custom_call.1
= control target key start
LH: loop header
LB: loop body
LE: loop exit
PB: predicated region body
PF: predicated region fallthrough
CT: control target
= control target key end

     0   :  { %10 = vsyncpa [#allocation6], 0  ;;  %s1452_s18 = smov 0   ;;  %s1454_s19 = smov 0   ;;  %s1692_s0 = inlined_call_operand.vmem [shape: f32[48,9], index: 0, kind: input, shape index: {}]   ;;  %s1693_s1 = inlined_call_operand.vmem [shape: f32[9,100], index: 1, kind: input, shape index: {}]   ;;  %s1694_s2 = inlined_call_operand.vmem [shape: f32[100,100], index: 2, kind: input, shape index: {}]   ;;  %s1695_s3 = inlined_call_operand.vmem [shape: f32[100,9], index: 3, kind: input, shape index: {}]   ;;  %s1696_s4 = inlined_call_operand.vmem [shape: f32[6], index: 4, kind: input, shape index: {}]   ;;  %s1697_s5 = inlined_call_operand.vmem [shape: f32[48,9], index: 5, kind: output, shape index: {}]  }
   0x1   :  { %s1456_s20 = smov 0   ;;  %s1458_s21 = smov 0  }
   0x2   :  { %s1460_s22 = smov 0  }
   0x3 LB: > { %s1048_s23 = sadd.s32 4294967295, %s1416_s22   ;;  %s25_s24 = sadd.s32 1, %s1408_s20  ;;  %s1416_s22 = sphi %s1460_s22, %s16_s22   ;;  %s1412_s21 = sphi %s1458_s21, %s1703_s21   ;;  %s1408_s20 = sphi %s1456_s20, %s1702_s20   ;;  %s1404_s19 = sphi %s1454_s19, %s1701_s19   ;;  %s1400_s18 = sphi %s1452_s18, %s1700_s18  }
   0x4   : > { %p26_p0 = scmp.ge.s32.totalorder %s25_s24, 3  ;;  %s28_s25 = sadd.s32 1, %s1412_s21 }
   0x5   : > { %p1050_p1 = scmp.ge.s32.totalorder %s1416_s22, 1  ;;  %p169_p2 = scmp.lt.s32.totalorder %s1416_s22, 13 }
   0x6   : > { %s1705_s24 = smov (%p26_p0, %s25_s24), 0  ;;  %s1707_s25 = smov (!%p26_p0, %s28_s25), %s1412_s21 }
   0x7   : > { %p1485_p3 = pnand %p1050_p1, %p169_p2  ;;  %p30_p4 = scmp.ge.s32.totalorder %s1707_s25, 4 }
   0x8   : > { %p1489_p5 = scmp.eq.s32.totalorder %s1048_s23, 0  ;;  %s191_s30 = sshll.u32 %s1696_s4, 4  ;;  %s192_s30 = int_to_ptr.vmem [resolvable:$true] %s191_s30 }
   0x9   : > { %p1295_p6 = pneg %p1485_p3  ;;  %s1709_s25 = smov (%p30_p4, %s1707_s25), 0 }
   0xa   : > { %s1359_s6 = scalar_lea.vmem %s192_s30, 16  ;;  %p1367_p12 = scmp.lt.s32.totalorder %s192_s30, %s192_s30 }
   0xb   : > { %p1296_p7 = pnand %p1489_p5, %p1295_p6  ;;  %p1360_p8 = scmp.ne.s32.totalorder %s192_s30, %s1359_s6 }
   0xc   : > { %p1368_p13 = scmp.lt.s32.totalorder %s1359_s6, %s1359_s6 }
   0xd   : > { %p1361_p9 = pneg %p1296_p7 }
   0xe   : > { %p1369_p0 = por %p1368_p13, %p1367_p12 }
   0xf   : > { %p1362_p10 = pnand %p1361_p9, %p1360_p8 }
  0x11   : > { %p1363_p11 = pneg %p1362_p10 }
  0x13   : > { %p1370_p1 = pnand %p1369_p0, %p1363_p11 }
  0x15   : > { %1373 = shalt.err (!%p1370_p1)
}
  0x16   : > { %s1418_s7 = smov [#allocation5]   ;;  %213 = sbr.rel (%p1485_p3) target bundleno = 2562 (0xa02), region = 40 }
  0x17   : > { %1298 = dma.vmem_to_smem (!%p1296_p7), %s192_s30, 16, %s1418_s7, [#allocation6]  }
  0x1d   : > { %1395 = dma.done.wait (%p1489_p5), [#allocation6], 16  }
  0x1e   : > { %1397 = vsyncadd (%p1489_p5), [#allocation6], 4294967280 }
  0x1f   : > { %219 = sfence }
  0x20   : > { %s1055_s8 = sshll.u32 %s1400_s18, 1  ;;  %p254_p2 = scmp.eq.s32.totalorder %s1404_s19, 0 }
  0x21   : > { %p243_p4 = scmp.lt.s32.totalorder %s1055_s8, 5  ;;  %p255_p6 = scmp.eq.s32.totalorder %s1400_s18, 0 }
  0x22   : > { %s1512_s9 = sshll.u32 %s1400_s18, 4  ;;  %s1419_s17 = smov 0.0  }
  0x23   : > { %s1711_s8 = smov (!%p243_p4, %s1055_s8), 5  ;;  %p256_p7 = pnand %p255_p6, %p254_p2 }
  0x24   : > { %s1056_s10 = sshll.u32 %s1711_s8, 3  ;;  %p1060_p3 = scmp.ne.s32.totalorder %s1404_s19, 0 }
  0x25   : > { %s246_s13 = scalar_lea.vmem %s1692_s0, %s1056_s10  ;;  %s1520_s16 = scalar_lea.vmem %s1697_s5, %s1056_s10  ;;  %v278_v0 = vld [vmem:[%s1693_s1] sm:$0xff] (!%p1060_p3)  ;;  %v279_v1 = vld [vmem:[%s1693_s1 + $0x8] sm:$0x1] (!%p1060_p3)  ;;  %vm287_vm0 = vcmask (!%p1060_p3), 1040384   ;;  %vm1420_vm1 = vmmov (!%p1060_p3), 1   ;;  %vm280_vm3 = vcmask (!%p1060_p3), 72704  }
  0x26   : > { %1289 = sst [smem:[#allocation4]] (!%p256_p7), %s1419_s17  ;;  %275 = sbr.rel (%p1060_p3) target bundleno = 688 (0x2b0), region = 52 }
  0x27   : > { %1290 = sst [smem:[#allocation4 + $0x1]] (!%p256_p7), %s1419_s17  ;;  %v276_v2 = vld [vmem:[%s246_s13] sm:$0xff] (!%p1060_p3)  ;;  %v1200_v3 = vpack.c.bf16 (!%p1060_p3), %v279_v1, %v278_v0  ;;  %vm1201_vm2 = vmpackc.low (!%p1060_p3), %vm287_vm0, %vm1420_vm1  ;;  %v277_v4 = vld [vmem:[%s246_s13 + $0x8] sm:$0xff] (!%p1060_p3)  ;;  %vm367_vm4 = vcmask (!%p1060_p3), 818176   ;;  %s366_s29 = scalar_lea.vmem (!%p1060_p3), [#allocation2], %s1512_s9 }
  0x28   : > { %1291 = sst [smem:[#allocation4 + $0x2]] (!%p256_p7), %s1419_s17  ;;  %1139 = vmatprep.mubr.msk.f32.mxu0 (!%p1060_p3), %vm280_vm3, %v276_v2  ;;  %p1064_p5 = scmp.ne.s32.totalorder (!%p1060_p3), %s1400_s18, 2 }
  0x29   : > { %1292 = sst [smem:[#allocation4 + $0x3]] (!%p256_p7), %s1419_s17  ;;  %1202 = vmatprep.subr.msk.bf16.mxu0 (!%p1060_p3), %vm1201_vm2, %v1200_v3 }
  0x2a   : > { %1293 = sst [smem:[#allocation4 + $0x4]] (!%p256_p7), %s1419_s17  ;;  %1205 = vmatpush3.bf16.msk.msra.mxu0 (!%p1060_p3), %vm1201_vm2, %v1200_v3 }
  0x2b   : > { %1294 = sst [smem:[#allocation4 + $0x5]] (!%p256_p7), %s1419_s17 }
  0x2d   : > { %1140 = vmatmul.mubr.msk.f32.vlgmr.msra.gmra.mrb[0].mxu0 %vm280_vm3, %v277_v4  ;;  %v374_v7 = vlaneseq (!%p1064_p5)  ;;  %v377_v8 = vstv (!%p1064_p5), %s1512_s9  ;;  %s388_s30 = sld [smem:[#allocation4]] (!%p1064_p5)  ;;  %s1065_s6 = sld [smem:[#allocation4 + $0x1]] (!%p1064_p5) }
  0x2f   : > { %v375_v9 = vshrl.u32 (!%p1064_p5), %v374_v7, 7 }
  0x31   : > { %v376_v10 = vadd.s32 (!%p1064_p5), 8, %v375_v9  ;;  %v378_v11 = vadd.s32 (!%p1064_p5), %v377_v8, %v375_v9 }
  0x33   : > { %v379_v12 = vadd.s32 (!%p1064_p5), %v377_v8, %v376_v10  ;;  %vm380_vm5 = vcmp.lt.s32.totalorder (!%p1064_p5), %v378_v11, 40 }
  0x35   : > { %vm381_vm6 = vcmp.lt.s32.totalorder (!%p1064_p5), %v379_v12, 40 }
  0xfc   : > { %373 = sbr.rel (%p1064_p5) target bundleno = 473 (0x1d9), region = 56 }
 0x100   : > { %v1141_v5 = vpop.f32.mrb[0].mxu0 }
 0x101   : > { %369 = vst.msk [vmem:[%s366_s29 + $0x8] sm:$0xff] %vm367_vm4, %v1141_v5  ;;  %v357_v6 = vpop.f32.mrb[1].mxu0  ;;  %v387_v16 = vsel (!%p1064_p5), %vm381_vm6, %v1141_v5, 0.0 }
 0x102   : > { %368 = vst.msk [vmem:[%s366_s29] sm:$0xff] %vm367_vm4, %v357_v6  ;;  %v386_v13 = vsel (!%p1064_p5), %vm380_vm5, %v357_v6, 0.0  ;;  %v390_v17 = vsel (!%p1064_p5), %vm367_vm4, %v387_v16, 0.0  ;;  %v406_v18 = vmul.f32 (!%p1064_p5), %v387_v16, %v387_v16 }
 0x103   : > { %v389_v14 = vsel %vm367_vm4, %v386_v13, 0.0  ;;  %v405_v15 = vmul.f32 %v386_v13, %v386_v13 }
 0x104   : > { %v391_v20 = vadd.f32 %v390_v17, %v389_v14  ;;  %v408_v21 = vsel %vm367_vm4, %v406_v18, 0.0 }
 0x105   : > { %v407_v19 = vsel %vm367_vm4, %v405_v15, 0.0 }
 0x106   : > { %392 = vadd.xlane.f32.xlu0 %v391_v20  ;;  %v409_v22 = vadd.f32 %v408_v21, %v407_v19 }
 0x10a   : > { %410 = vadd.xlane.f32.xlu0 %v409_v22 }
 0x193   : > { %v393_v23 = vpop.xlane.xlu0 %392 }
 0x194   : > { %v394_v24 = vrot.slane %v393_v23, 4 }
 0x196   : > { %v395_v25 = vadd.f32 %v394_v24, %v393_v23 }
 0x197   : > { %v411_v26 = vpop.xlane.xlu0 %410 }
 0x198   : > { %v396_v27 = vrot.slane %v395_v25, 2  ;;  %v412_v28 = vrot.slane %v411_v26, 4 }
 0x19a   : > { %v413_v29 = vadd.f32 %v412_v28, %v411_v26  ;;  %v397_v30 = vadd.f32 %v396_v27, %v395_v25 }
 0x19c   : > { %v414_v31 = vrot.slane %v413_v29, 2  ;;  %v398_v32 = vrot.slane %v397_v30, 1 }
 0x19e   : > { %v415_v33 = vadd.f32 %v414_v31, %v413_v29  ;;  %v399_v34 = vadd.f32 %v398_v32, %v397_v30 }
 0x1a0   : > { %1254 = vpush %v399_v34  ;;  %v416_v35 = vrot.slane %v415_v33, 1 }
 0x1a2   : > { %v417_v36 = vadd.f32 %v416_v35, %v415_v33 }
 0x1a4   : > { %1256 = vpush %v417_v36 }
 0x1d1   : > { %s1255_s7 = spop %1254 }
 0x1d2   : > { %s401_s8 = sadd.f32 %s1255_s7, %s388_s30 }
 0x1d4   : > { %403 = sst [smem:[#allocation4]] %s401_s8 }
 0x1d5   : > { %s1257_s10 = spop %1256 }
 0x1d6   : > { %s419_s11 = sadd.f32 %s1257_s10, %s1065_s6 }
 0x1d8   : > { %421 = sst [smem:[#allocation4 + $0x1]] %s419_s11 }
 0x1d9 PF: > { %p1066_p8 = scmp.eq.s32.totalorder %s1400_s18, 2 }
 0x1da   : > { %v427_v37 = vsel (!%p1066_p8), %vm367_vm4, %v357_v6, 0.0  ;;  %v428_v38 = vsel (!%p1066_p8), %vm367_vm4, %v1141_v5, 0.0  ;;  %v443_v39 = vmul.f32 (!%p1066_p8), %v357_v6, %v357_v6  ;;  %v444_v40 = vmul.f32 (!%p1066_p8), %v1141_v5, %v1141_v5  ;;  %s426_s12 = sld [smem:[#allocation4]] (!%p1066_p8)  ;;  %s1067_s13 = sld [smem:[#allocation4 + $0x1]] (!%p1066_p8) }
 0x1db   : > { %425 = sbr.rel (%p1066_p8) target bundleno = 688 (0x2b0), region = 60  ;;  %v429_v41 = vadd.f32 (!%p1066_p8), %v428_v38, %v427_v37 }
 0x1dc   : > { %v445_v42 = vsel (!%p1066_p8), %vm367_vm4, %v443_v39, 0.0  ;;  %v446_v43 = vsel (!%p1066_p8), %vm367_vm4, %v444_v40, 0.0 }
 0x1dd   : > { %430 = vadd.xlane.f32.xlu0 (!%p1066_p8), %v429_v41  ;;  %v447_v44 = vadd.f32 (!%p1066_p8), %v446_v43, %v445_v42 }
 0x1e1   : > { %448 = vadd.xlane.f32.xlu0 (!%p1066_p8), %v447_v44 }
 0x26a   : > { %v431_v45 = vpop.xlane.xlu0 %430 }
 0x26b   : > { %v432_v46 = vrot.slane %v431_v45, 4 }
 0x26d   : > { %v433_v47 = vadd.f32 %v432_v46, %v431_v45 }
 0x26e   : > { %v449_v48 = vpop.xlane.xlu0 %448 }
 0x26f   : > { %v434_v49 = vrot.slane %v433_v47, 2  ;;  %v450_v50 = vrot.slane %v449_v48, 4 }
 0x271   : > { %v451_v51 = vadd.f32 %v450_v50, %v449_v48  ;;  %v435_v52 = vadd.f32 %v434_v49, %v433_v47 }
 0x273   : > { %v452_v53 = vrot.slane %v451_v51, 2  ;;  %v436_v54 = vrot.slane %v435_v52, 1 }
 0x275   : > { %v453_v55 = vadd.f32 %v452_v53, %v451_v51  ;;  %v437_v56 = vadd.f32 %v436_v54, %v435_v52 }
 0x277   : > { %1258 = vpush %v437_v56  ;;  %v454_v57 = vrot.slane %v453_v55, 1 }
 0x279   : > { %v455_v58 = vadd.f32 %v454_v57, %v453_v55 }
 0x27b   : > { %1260 = vpush %v455_v58 }
 0x2a8   : > { %s1259_s14 = spop %1258 }
 0x2a9   : > { %s439_s15 = sadd.f32 %s1259_s14, %s426_s12 }
 0x2ab   : > { %441 = sst [smem:[#allocation4]] %s439_s15 }
 0x2ac   : > { %s1261_s17 = spop %1260 }
 0x2ad   : > { %s457_s23 = sadd.f32 %s1261_s17, %s1067_s13 }
 0x2af   : > { %459 = sst [smem:[#allocation4 + $0x1]] %s457_s23 }
 0x2b0 PF: > { %p1068_p9 = scmp.ne.s32.totalorder %s1404_s19, 1 }
 0x2b1   : > { %s464_s26 = sld [smem:[#allocation4]] (!%p1068_p9)  ;;  %s1069_s27 = sld [smem:[#allocation4 + $0x1]] (!%p1068_p9)  ;;  %v490_v59 = vld [vmem:[%s1694_s2] sm:$0xff] (!%p1068_p9)  ;;  %v491_v60 = vld [vmem:[%s1694_s2 + $0x8] sm:$0xff] (!%p1068_p9)  ;;  %v492_v62 = vld [vmem:[%s1694_s2 + $0x10] sm:$0xff] (!%p1068_p9)  ;;  %vm510_vm7 = vcmask (!%p1068_p9), 1043456  }
 0x2b2   : > { %463 = sbr.rel (%p1068_p9) target bundleno = 1420 (0x58c), region = 64  ;;  %v1206_v61 = vpack.c.bf16 (!%p1068_p9), %v491_v60, %v490_v59  ;;  %v493_v63 = vld [vmem:[%s1694_s2 + $0x18] sm:$0xff] (!%p1068_p9)  ;;  %v494_v1 = vld [vmem:[%s1694_s2 + $0x20] sm:$0xff] (!%p1068_p9)  ;;  %v495_v2 = vld [vmem:[%s1694_s2 + $0x28] sm:$0xff] (!%p1068_p9)  ;;  %s466_s30 = sld [smem:[#allocation5]] (!%p1068_p9)  ;;  %vm503_vm8 = vcmask (!%p1068_p9), 818176  }
 0x2b3   : > { %v1210_v0 = vpack.c.bf16 (!%p1068_p9), %v493_v63, %v492_v62  ;;  %v1214_v3 = vpack.c.bf16 (!%p1068_p9), %v495_v2, %v494_v1  ;;  %v496_v4 = vld [vmem:[%s1694_s2 + $0x30] sm:$0xff] (!%p1068_p9)  ;;  %v497_v5 = vld [vmem:[%s1694_s2 + $0x38] sm:$0xff] (!%p1068_p9)  ;;  %v498_v7 = vld [vmem:[%s1694_s2 + $0x40] sm:$0xff] (!%p1068_p9)  ;;  %s479_s11 = scalar_lea.vmem (!%p1068_p9), [#allocation2], %s1512_s9  ;;  %p1074_p10 = scmp.ne.s32.totalorder (!%p1068_p9), %s1400_s18, 2 }
 0x2b4   : > { %1207 = vmatprep.subr.bf16.mxu0 (!%p1068_p9), %v1206_v61  ;;  %v1218_v6 = vpack.c.bf16 (!%p1068_p9), %v497_v5, %v496_v4  ;;  %v499_v8 = vld [vmem:[%s1694_s2 + $0x48] sm:$0xff] (!%p1068_p9)  ;;  %v500_v11 = vld [vmem:[%s1694_s2 + $0x50] sm:$0xff] (!%p1068_p9)  ;;  %v501_v12 = vld [vmem:[%s1694_s2 + $0x58] sm:$0xff] (!%p1068_p9) }
 0x2b5   : > { %1209 = vmatpush3.bf16.msra.mxu0 (!%p1068_p9), %v1206_v61  ;;  %v1222_v9 = vpack.c.bf16 (!%p1068_p9), %v499_v8, %v498_v7  ;;  %v1226_v13 = vpack.c.bf16 (!%p1068_p9), %v501_v12, %v500_v11  ;;  %v502_v14 = vld [vmem:[%s1694_s2 + $0x60] sm:$0xf] (!%p1068_p9)  ;;  %v481_v17 = vld [vmem:[%s479_s11 + $0x8] sm:$0xff] (!%p1068_p9) }
 0x2b6   : > { %1211 = vmatprep.subr.bf16.mxu0 (!%p1068_p9), %v1210_v0  ;;  %v480_v16 = vld [vmem:[%s479_s11] sm:$0xff] (!%p1068_p9) }
 0x2b7   : > { %s1562_s17 = smul.f32 (!%p1068_p9), 0.00025, %s464_s26 }
 0x2b8   : > { %s469_s6 = smul.f32 (!%p1068_p9), 0.00025, %s1069_s27 }
 0x2b9   : > { %s470_s7 = smul.f32 %s1562_s17, %s1562_s17  ;;  %1213 = vmatpush3.bf16.msra.mxu0 %v1210_v0  ;;  %v595_v28 = vlaneseq (!%p1074_p10)  ;;  %v598_v29 = vstv (!%p1074_p10), %s1512_s9  ;;  %s1076_s12 = sld [smem:[#allocation4 + $0x3]] (!%p1074_p10) }
 0x2ba   : > { %1215 = vmatprep.subr.bf16.mxu0 %v1214_v3 }
 0x2bb   : > { %s471_s8 = ssub.f32 %s469_s6, %s470_s7  ;;  %s1070_s6 = sld [smem:[#allocation5 + $0x1]]  ;;  %v596_v30 = vshrl.u32 (!%p1074_p10), %v595_v28, 7 }
 0x2bd   : > { %s472_s13 = sadd.f32 1e-05, %s471_s8  ;;  %1217 = vmatpush3.bf16.msra.mxu0 %v1214_v3  ;;  %v597_v31 = vadd.s32 (!%p1074_p10), 8, %v596_v30  ;;  %v599_v32 = vadd.s32 (!%p1074_p10), %v598_v29, %v596_v30 }
 0x2be   : > { %1219 = vmatprep.subr.bf16.mxu0 %v1218_v6 }
 0x2bf   : > { %v473_v10 = vstv %s472_s13  ;;  %v600_v33 = vadd.s32 (!%p1074_p10), %v598_v29, %v597_v31  ;;  %vm601_vm9 = vcmp.lt.s32.totalorder (!%p1074_p10), %v599_v32, 40 }
 0x2c0   : > { %1345 = vrsqrt.f32 %v473_v10 }
 0x2c1   : > { %1221 = vmatpush3.bf16.msra.mxu0 %v1218_v6  ;;  %vm602_vm10 = vcmp.lt.s32.totalorder (!%p1074_p10), %v600_v33, 40 }
 0x2c2   : > { %1223 = vmatprep.subr.bf16.mxu0 %v1222_v9 }
 0x2c5   : > { %1225 = vmatpush3.bf16.msra.mxu0 %v1222_v9 }
 0x2c6   : > { %1227 = vmatprep.subr.bf16.mxu0 %v1226_v13 }
 0x2c9   : > { %1229 = vmatpush3.bf16.msra.mxu0 %v1226_v13 }
 0x2ca   : > { %v1346_v15 = vpop.eup %1345  ;;  %1166 = vmatprep.subr.msk.mxu0 %vm510_vm7, %v502_v14 }
 0x2cb   : > { %1262 = vpush %v1346_v15 }
 0x2cd   : > { %1167 = vmatpush3.msk.msra.mxu0 %vm510_vm7, %v502_v14 }
 0x2fc   : > { %s1263_s7 = spop %1262 }
 0x2fd   : > { %s476_s8 = smul.f32 %s1263_s7, %s466_s30 }
 0x2ff   : > { %s477_s10 = smul.f32 %s476_s8, %s1562_s17  ;;  %v482_v18 = vstv %s476_s8  ;;  %s1075_s17 = sld [smem:[#allocation4 + $0x2]] (!%p1074_p10) }
 0x300   : > { %v483_v19 = vmul.f32 %v482_v18, %v480_v16  ;;  %v484_v20 = vmul.f32 %v482_v18, %v481_v17 }
 0x301   : > { %s478_s26 = ssub.f32 %s1070_s6, %s477_s10 }
 0x303   : > { %v485_v21 = vstv %s478_s26 }
 0x304   : > { %v486_v22 = vadd.f32 %v485_v21, %v483_v19  ;;  %v487_v23 = vadd.f32 %v485_v21, %v484_v20 }
 0x306   : > { %v488_v24 = vmax.f32 %v486_v22, 0.0  ;;  %v489_v25 = vmax.f32 %v487_v23, 0.0 }
 0x308   : > { %1168 = vmatprep.mubr.msk.f32.mxu0 %vm503_vm8, %v488_v24 }
 0x309   : > { %1169 = vmatmul.mubr.msk.f32.vlgmr.msra.gmra.mrb[0].mxu0 %vm503_vm8, %v489_v25 }
 0x3d8   : > { %594 = sbr.rel (%p1074_p10) target bundleno = 1205 (0x4b5), region = 68 }
 0x3dc   : > { %v1170_v26 = vpop.f32.mrb[0].mxu0 }
 0x3dd   : > { %590 = vst.msk [vmem:[%s479_s11 + $0x8] sm:$0xff] %vm503_vm8, %v1170_v26  ;;  %v580_v27 = vpop.f32.mrb[1].mxu0  ;;  %v608_v37 = vsel (!%p1074_p10), %vm602_vm10, %v1170_v26, 0.0 }
 0x3de   : > { %589 = vst.msk [vmem:[%s479_s11] sm:$0xff] %vm503_vm8, %v580_v27  ;;  %v607_v34 = vsel (!%p1074_p10), %vm601_vm9, %v580_v27, 0.0  ;;  %v611_v38 = vsel (!%p1074_p10), %vm503_vm8, %v608_v37, 0.0  ;;  %v627_v39 = vmul.f32 (!%p1074_p10), %v608_v37, %v608_v37 }
 0x3df   : > { %v610_v35 = vsel %vm503_vm8, %v607_v34, 0.0  ;;  %v626_v36 = vmul.f32 %v607_v34, %v607_v34 }
 0x3e0   : > { %v612_v41 = vadd.f32 %v611_v38, %v610_v35  ;;  %v629_v42 = vsel %vm503_vm8, %v627_v39, 0.0 }
 0x3e1   : > { %v628_v40 = vsel %vm503_vm8, %v626_v36, 0.0 }
 0x3e2   : > { %613 = vadd.xlane.f32.xlu0 %v612_v41  ;;  %v630_v43 = vadd.f32 %v629_v42, %v628_v40 }
 0x3e6   : > { %631 = vadd.xlane.f32.xlu0 %v630_v43 }
 0x46f   : > { %v614_v44 = vpop.xlane.xlu0 %613 }
 0x470   : > { %v615_v45 = vrot.slane %v614_v44, 4 }
 0x472   : > { %v616_v46 = vadd.f32 %v615_v45, %v614_v44 }
 0x473   : > { %v632_v47 = vpop.xlane.xlu0 %631 }
 0x474   : > { %v617_v48 = vrot.slane %v616_v46, 2  ;;  %v633_v49 = vrot.slane %v632_v47, 4 }
 0x476   : > { %v634_v50 = vadd.f32 %v633_v49, %v632_v47  ;;  %v618_v51 = vadd.f32 %v617_v48, %v616_v46 }
 0x478   : > { %v635_v52 = vrot.slane %v634_v50, 2  ;;  %v619_v53 = vrot.slane %v618_v51, 1 }
 0x47a   : > { %v636_v54 = vadd.f32 %v635_v52, %v634_v50  ;;  %v620_v55 = vadd.f32 %v619_v53, %v618_v51 }
 0x47c   : > { %1264 = vpush %v620_v55  ;;  %v637_v56 = vrot.slane %v636_v54, 1 }
 0x47e   : > { %v638_v57 = vadd.f32 %v637_v56, %v636_v54 }
 0x480   : > { %1266 = vpush %v638_v57 }
 0x4ad   : > { %s1265_s13 = spop %1264 }
 0x4ae   : > { %s622_s27 = sadd.f32 %s1265_s13, %s1075_s17 }
 0x4b0   : > { %624 = sst [smem:[#allocation4 + $0x2]] %s622_s27 }
 0x4b1   : > { %s1267_s14 = spop %1266 }
 0x4b2   : > { %s640_s15 = sadd.f32 %s1267_s14, %s1076_s12 }
 0x4b4   : > { %642 = sst [smem:[#allocation4 + $0x3]] %s640_s15 }
 0x4b5 PF: > { %p1077_p11 = scmp.eq.s32.totalorder %s1400_s18, 2 }
 0x4b6   : > { %v648_v58 = vsel (!%p1077_p11), %vm503_vm8, %v580_v27, 0.0  ;;  %v649_v59 = vsel (!%p1077_p11), %vm503_vm8, %v1170_v26, 0.0  ;;  %v664_v60 = vmul.f32 (!%p1077_p11), %v580_v27, %v580_v27  ;;  %v665_v61 = vmul.f32 (!%p1077_p11), %v1170_v26, %v1170_v26  ;;  %s1078_s23 = sld [smem:[#allocation4 + $0x2]] (!%p1077_p11)  ;;  %s1079_s28 = sld [smem:[#allocation4 + $0x3]] (!%p1077_p11) }
 0x4b7   : > { %646 = sbr.rel (%p1077_p11) target bundleno = 1420 (0x58c), region = 72  ;;  %v650_v62 = vadd.f32 (!%p1077_p11), %v649_v59, %v648_v58 }
 0x4b8   : > { %v666_v63 = vsel (!%p1077_p11), %vm503_vm8, %v664_v60, 0.0  ;;  %v667_v0 = vsel (!%p1077_p11), %vm503_vm8, %v665_v61, 0.0 }
 0x4b9   : > { %651 = vadd.xlane.f32.xlu0 (!%p1077_p11), %v650_v62  ;;  %v668_v1 = vadd.f32 (!%p1077_p11), %v667_v0, %v666_v63 }
 0x4bd   : > { %669 = vadd.xlane.f32.xlu0 (!%p1077_p11), %v668_v1 }
 0x546   : > { %v652_v2 = vpop.xlane.xlu0 %651 }
 0x547   : > { %v653_v3 = vrot.slane %v652_v2, 4 }
 0x549   : > { %v654_v4 = vadd.f32 %v653_v3, %v652_v2 }
 0x54a   : > { %v670_v5 = vpop.xlane.xlu0 %669 }
 0x54b   : > { %v655_v6 = vrot.slane %v654_v4, 2  ;;  %v671_v7 = vrot.slane %v670_v5, 4 }
 0x54d   : > { %v672_v8 = vadd.f32 %v671_v7, %v670_v5  ;;  %v656_v9 = vadd.f32 %v655_v6, %v654_v4 }
 0x54f   : > { %v673_v10 = vrot.slane %v672_v8, 2  ;;  %v657_v11 = vrot.slane %v656_v9, 1 }
 0x551   : > { %v674_v12 = vadd.f32 %v673_v10, %v672_v8  ;;  %v658_v13 = vadd.f32 %v657_v11, %v656_v9 }
 0x553   : > { %1268 = vpush %v658_v13  ;;  %v675_v14 = vrot.slane %v674_v12, 1 }
 0x555   : > { %v676_v15 = vadd.f32 %v675_v14, %v674_v12 }
 0x557   : > { %1270 = vpush %v676_v15 }
 0x584   : > { %s1269_s29 = spop %1268 }
 0x585   : > { %s660_s30 = sadd.f32 %s1269_s29, %s1078_s23 }
 0x587   : > { %662 = sst [smem:[#allocation4 + $0x2]] %s660_s30 }
 0x588   : > { %s1271_s6 = spop %1270 }
 0x589   : > { %s678_s7 = sadd.f32 %s1271_s6, %s1079_s28 }
 0x58b   : > { %680 = sst [smem:[#allocation4 + $0x3]] %s678_s7 }
 0x58c PF: > { %p1080_p12 = scmp.ne.s32.totalorder %s1404_s19, 2 }
 0x58d   : > { %s1081_s8 = sld [smem:[#allocation4 + $0x2]] (!%p1080_p12)  ;;  %s1082_s10 = sld [smem:[#allocation4 + $0x3]] (!%p1080_p12)  ;;  %v711_v16 = vld [vmem:[%s1695_s3] sm:$0xff] (!%p1080_p12)  ;;  %v712_v17 = vld [vmem:[%s1695_s3 + $0x8] sm:$0xff] (!%p1080_p12)  ;;  %v713_v19 = vld [vmem:[%s1695_s3 + $0x10] sm:$0xff] (!%p1080_p12)  ;;  %vm731_vm11 = vcmask (!%p1080_p12), 1043456  }
 0x58e   : > { %684 = sbr.rel (%p1080_p12) target bundleno = 2152 (0x868), region = 76  ;;  %v1230_v18 = vpack.c.bf16 (!%p1080_p12), %v712_v17, %v711_v16  ;;  %v714_v20 = vld [vmem:[%s1695_s3 + $0x18] sm:$0xff] (!%p1080_p12)  ;;  %v715_v22 = vld [vmem:[%s1695_s3 + $0x20] sm:$0xff] (!%p1080_p12)  ;;  %v716_v23 = vld [vmem:[%s1695_s3 + $0x28] sm:$0xff] (!%p1080_p12)  ;;  %s1083_s17 = sld [smem:[#allocation5 + $0x2]] (!%p1080_p12)  ;;  %vm724_vm12 = vcmask (!%p1080_p12), 818176  }
 0x58f   : > { %v1234_v21 = vpack.c.bf16 (!%p1080_p12), %v714_v20, %v713_v19  ;;  %v1238_v24 = vpack.c.bf16 (!%p1080_p12), %v716_v23, %v715_v22  ;;  %v717_v25 = vld [vmem:[%s1695_s3 + $0x30] sm:$0xff] (!%p1080_p12)  ;;  %v718_v26 = vld [vmem:[%s1695_s3 + $0x38] sm:$0xff] (!%p1080_p12)  ;;  %v719_v28 = vld [vmem:[%s1695_s3 + $0x40] sm:$0xff] (!%p1080_p12)  ;;  %s700_s15 = scalar_lea.vmem (!%p1080_p12), [#allocation2], %s1512_s9  ;;  %vm811_vm13 = vcmask (!%p1080_p12), 72704   ;;  %s810_s23 = scalar_lea.vmem (!%p1080_p12), [#allocation3], %s1512_s9 }
 0x590   : > { %1231 = vmatprep.subr.bf16.mxu0 (!%p1080_p12), %v1230_v18  ;;  %v1242_v27 = vpack.c.bf16 (!%p1080_p12), %v718_v26, %v717_v25  ;;  %v720_v29 = vld [vmem:[%s1695_s3 + $0x48] sm:$0xff] (!%p1080_p12)  ;;  %v721_v32 = vld [vmem:[%s1695_s3 + $0x50] sm:$0xff] (!%p1080_p12)  ;;  %v722_v33 = vld [vmem:[%s1695_s3 + $0x58] sm:$0xff] (!%p1080_p12)  ;;  %p1088_p13 = scmp.ne.s32.totalorder (!%p1080_p12), %s1400_s18, 2 }
 0x591   : > { %1233 = vmatpush3.bf16.msra.mxu0 (!%p1080_p12), %v1230_v18  ;;  %v1246_v30 = vpack.c.bf16 (!%p1080_p12), %v720_v29, %v719_v28  ;;  %v1250_v34 = vpack.c.bf16 (!%p1080_p12), %v722_v33, %v721_v32  ;;  %v723_v35 = vld [vmem:[%s1695_s3 + $0x60] sm:$0xf] (!%p1080_p12)  ;;  %v702_v38 = vld [vmem:[%s700_s15 + $0x8] sm:$0xff] (!%p1080_p12) }
 0x592   : > { %1235 = vmatprep.subr.bf16.mxu0 (!%p1080_p12), %v1234_v21  ;;  %v701_v37 = vld [vmem:[%s700_s15] sm:$0xff] (!%p1080_p12) }
 0x593   : > { %s1623_s6 = smul.f32 (!%p1080_p12), 0.00025, %s1081_s8 }
 0x594   : > { %s690_s12 = smul.f32 (!%p1080_p12), 0.00025, %s1082_s10 }
 0x595   : > { %s691_s13 = smul.f32 %s1623_s6, %s1623_s6  ;;  %1237 = vmatpush3.bf16.msra.mxu0 %v1234_v21  ;;  %v818_v49 = vlaneseq (!%p1088_p13)  ;;  %v821_v50 = vstv (!%p1088_p13), %s1512_s9 }
 0x596   : > { %1239 = vmatprep.subr.bf16.mxu0 %v1238_v24 }
 0x597   : > { %s692_s27 = ssub.f32 %s690_s12, %s691_s13  ;;  %s1084_s12 = sld [smem:[#allocation5 + $0x3]]  ;;  %v819_v51 = vshrl.u32 (!%p1088_p13), %v818_v49, 7 }
 0x599   : > { %s693_s28 = sadd.f32 1e-05, %s692_s27  ;;  %1241 = vmatpush3.bf16.msra.mxu0 %v1238_v24  ;;  %v820_v52 = vadd.s32 (!%p1088_p13), 8, %v819_v51  ;;  %v822_v53 = vadd.s32 (!%p1088_p13), %v821_v50, %v819_v51 }
 0x59a   : > { %1243 = vmatprep.subr.bf16.mxu0 %v1242_v27 }
 0x59b   : > { %v694_v31 = vstv %s693_s28  ;;  %v823_v54 = vadd.s32 (!%p1088_p13), %v821_v50, %v820_v52  ;;  %vm824_vm14 = vcmp.lt.s32.totalorder (!%p1088_p13), %v822_v53, 40  ;;  %s1090_s28 = sld [smem:[#allocation4 + $0x5]] (!%p1088_p13) }
 0x59c   : > { %1347 = vrsqrt.f32 %v694_v31 }
 0x59d   : > { %1245 = vmatpush3.bf16.msra.mxu0 %v1242_v27  ;;  %vm825_vm15 = vcmp.lt.s32.totalorder (!%p1088_p13), %v823_v54, 40 }
 0x59e   : > { %1247 = vmatprep.subr.bf16.mxu0 %v1246_v30 }
 0x5a1   : > { %1249 = vmatpush3.bf16.msra.mxu0 %v1246_v30 }
 0x5a2   : > { %1251 = vmatprep.subr.bf16.mxu0 %v1250_v34 }
 0x5a5   : > { %1253 = vmatpush3.bf16.msra.mxu0 %v1250_v34 }
 0x5a6   : > { %v1348_v36 = vpop.eup %1347  ;;  %1195 = vmatprep.subr.msk.mxu0 %vm731_vm11, %v723_v35 }
 0x5a7   : > { %1272 = vpush %v1348_v36 }
 0x5a9   : > { %1196 = vmatpush3.msk.msra.mxu0 %vm731_vm11, %v723_v35 }
 0x5d8   : > { %s1273_s13 = spop %1272 }
 0x5d9   : > { %s697_s27 = smul.f32 %s1273_s13, %s1083_s17 }
 0x5db   : > { %s698_s14 = smul.f32 %s697_s27, %s1623_s6  ;;  %v703_v39 = vstv %s697_s27  ;;  %s1089_s6 = sld [smem:[#allocation4 + $0x4]] (!%p1088_p13) }
 0x5dc   : > { %v704_v40 = vmul.f32 %v703_v39, %v701_v37  ;;  %v705_v41 = vmul.f32 %v703_v39, %v702_v38 }
 0x5dd   : > { %s699_s8 = ssub.f32 %s1084_s12, %s698_s14 }
 0x5df   : > { %v706_v42 = vstv %s699_s8 }
 0x5e0   : > { %v707_v43 = vadd.f32 %v706_v42, %v704_v40  ;;  %v708_v44 = vadd.f32 %v706_v42, %v705_v41 }
 0x5e2   : > { %v709_v45 = vmax.f32 %v707_v43, 0.0  ;;  %v710_v46 = vmax.f32 %v708_v44, 0.0 }
 0x5e4   : > { %1197 = vmatprep.mubr.msk.f32.mxu0 %vm724_vm12, %v709_v45 }
 0x5e5   : > { %1198 = vmatmul.mubr.msk.f32.vlgmr.msra.gmra.mrb[0].mxu0 %vm724_vm12, %v710_v46 }
 0x6b4   : > { %817 = sbr.rel (%p1088_p13) target bundleno = 1937 (0x791), region = 80 }
 0x6b8   : > { %v1199_v47 = vpop.f32.mrb[0].mxu0 }
 0x6b9   : > { %813 = vst.msk [vmem:[%s810_s23 + $0x8] sm:$0xff] %vm811_vm13, %v1199_v47  ;;  %v801_v48 = vpop.f32.mrb[1].mxu0  ;;  %v831_v58 = vsel (!%p1088_p13), %vm825_vm15, %v1199_v47, 0.0 }
 0x6ba   : > { %812 = vst.msk [vmem:[%s810_s23] sm:$0xff] %vm811_vm13, %v801_v48  ;;  %v830_v55 = vsel (!%p1088_p13), %vm824_vm14, %v801_v48, 0.0  ;;  %v834_v59 = vsel (!%p1088_p13), %vm811_vm13, %v831_v58, 0.0  ;;  %v850_v60 = vmul.f32 (!%p1088_p13), %v831_v58, %v831_v58 }
 0x6bb   : > { %v833_v56 = vsel %vm811_vm13, %v830_v55, 0.0  ;;  %v849_v57 = vmul.f32 %v830_v55, %v830_v55 }
 0x6bc   : > { %v835_v62 = vadd.f32 %v834_v59, %v833_v56  ;;  %v852_v63 = vsel %vm811_vm13, %v850_v60, 0.0 }
 0x6bd   : > { %v851_v61 = vsel %vm811_vm13, %v849_v57, 0.0 }
 0x6be   : > { %836 = vadd.xlane.f32.xlu0 %v835_v62  ;;  %v853_v0 = vadd.f32 %v852_v63, %v851_v61 }
 0x6c2   : > { %854 = vadd.xlane.f32.xlu0 %v853_v0 }
 0x74b   : > { %v837_v1 = vpop.xlane.xlu0 %836 }
 0x74c   : > { %v838_v2 = vrot.slane %v837_v1, 4 }
 0x74e   : > { %v839_v3 = vadd.f32 %v838_v2, %v837_v1 }
 0x74f   : > { %v855_v4 = vpop.xlane.xlu0 %854 }
 0x750   : > { %v840_v5 = vrot.slane %v839_v3, 2  ;;  %v856_v6 = vrot.slane %v855_v4, 4 }
 0x752   : > { %v857_v7 = vadd.f32 %v856_v6, %v855_v4  ;;  %v841_v8 = vadd.f32 %v840_v5, %v839_v3 }
 0x754   : > { %v858_v9 = vrot.slane %v857_v7, 2  ;;  %v842_v10 = vrot.slane %v841_v8, 1 }
 0x756   : > { %v859_v11 = vadd.f32 %v858_v9, %v857_v7  ;;  %v843_v12 = vadd.f32 %v842_v10, %v841_v8 }
 0x758   : > { %1274 = vpush %v843_v12  ;;  %v860_v13 = vrot.slane %v859_v11, 1 }
 0x75a   : > { %v861_v14 = vadd.f32 %v860_v13, %v859_v11 }
 0x75c   : > { %1276 = vpush %v861_v14 }
 0x789   : > { %s1275_s10 = spop %1274 }
 0x78a   : > { %s845_s29 = sadd.f32 %s1275_s10, %s1089_s6 }
 0x78c   : > { %847 = sst [smem:[#allocation4 + $0x4]] %s845_s29 }
 0x78d   : > { %s1277_s30 = spop %1276 }
 0x78e   : > { %s863_s7 = sadd.f32 %s1277_s30, %s1090_s28 }
 0x790   : > { %865 = sst [smem:[#allocation4 + $0x5]] %s863_s7 }
 0x791 PF: > { %p1091_p0 = scmp.eq.s32.totalorder %s1400_s18, 2 }
 0x792   : > { %v871_v15 = vsel (!%p1091_p0), %vm811_vm13, %v801_v48, 0.0  ;;  %v872_v16 = vsel (!%p1091_p0), %vm811_vm13, %v1199_v47, 0.0  ;;  %v887_v17 = vmul.f32 (!%p1091_p0), %v801_v48, %v801_v48  ;;  %v888_v18 = vmul.f32 (!%p1091_p0), %v1199_v47, %v1199_v47  ;;  %s1092_s18 = sld [smem:[#allocation4 + $0x4]] (!%p1091_p0)  ;;  %s1093_s11 = sld [smem:[#allocation4 + $0x5]] (!%p1091_p0) }
 0x793   : > { %869 = sbr.rel (%p1091_p0) target bundleno = 2152 (0x868), region = 84  ;;  %v873_v19 = vadd.f32 (!%p1091_p0), %v872_v16, %v871_v15 }
 0x794   : > { %v889_v20 = vsel (!%p1091_p0), %vm811_vm13, %v887_v17, 0.0  ;;  %v890_v21 = vsel (!%p1091_p0), %vm811_vm13, %v888_v18, 0.0 }
 0x795   : > { %874 = vadd.xlane.f32.xlu0 (!%p1091_p0), %v873_v19  ;;  %v891_v22 = vadd.f32 (!%p1091_p0), %v890_v21, %v889_v20 }
 0x799   : > { %892 = vadd.xlane.f32.xlu0 (!%p1091_p0), %v891_v22 }
 0x822   : > { %v875_v23 = vpop.xlane.xlu0 %874 }
 0x823   : > { %v876_v24 = vrot.slane %v875_v23, 4 }
 0x825   : > { %v877_v25 = vadd.f32 %v876_v24, %v875_v23 }
 0x826   : > { %v893_v26 = vpop.xlane.xlu0 %892 }
 0x827   : > { %v878_v27 = vrot.slane %v877_v25, 2  ;;  %v894_v28 = vrot.slane %v893_v26, 4 }
 0x829   : > { %v895_v29 = vadd.f32 %v894_v28, %v893_v26  ;;  %v879_v30 = vadd.f32 %v878_v27, %v877_v25 }
 0x82b   : > { %v896_v31 = vrot.slane %v895_v29, 2  ;;  %v880_v32 = vrot.slane %v879_v30, 1 }
 0x82d   : > { %v897_v33 = vadd.f32 %v896_v31, %v895_v29  ;;  %v881_v34 = vadd.f32 %v880_v32, %v879_v30 }
 0x82f   : > { %1278 = vpush %v881_v34  ;;  %v898_v35 = vrot.slane %v897_v33, 1 }
 0x831   : > { %v899_v36 = vadd.f32 %v898_v35, %v897_v33 }
 0x833   : > { %1280 = vpush %v899_v36 }
 0x860   : > { %s1279_s26 = spop %1278 }
 0x861   : > { %s883_s17 = sadd.f32 %s1279_s26, %s1092_s18 }
 0x863   : > { %885 = sst [smem:[#allocation4 + $0x4]] %s883_s17 }
 0x864   : > { %s1281_s12 = spop %1280 }
 0x865   : > { %s901_s13 = sadd.f32 %s1281_s12, %s1093_s11 }
 0x867   : > { %903 = sst [smem:[#allocation4 + $0x5]] %s901_s13 }
 0x868 PF: > { %p1094_p1 = scmp.ne.s32.totalorder %s1404_s19, 3 }
 0x869   : > { %s1095_s27 = sld [smem:[#allocation4 + $0x4]] (!%p1094_p1)  ;;  %s1096_s14 = sld [smem:[#allocation4 + $0x5]] (!%p1094_p1)  ;;  %vm926_vm0 = vcmask (!%p1094_p1), 72704  }
 0x86a   : > { %907 = sbr.rel (%p1094_p1) target bundleno = 2553 (0x9f9), region = 88  ;;  %s1097_s10 = sld [smem:[#allocation5 + $0x4]] (!%p1094_p1) }
 0x86b   : > { %s920_s7 = scalar_lea.vmem (!%p1094_p1), [#allocation3], %s1512_s9 }
 0x86c   : > { %v921_v39 = vld [vmem:[%s920_s7] sm:$0xff] (!%p1094_p1)  ;;  %v922_v40 = vld [vmem:[%s920_s7 + $0x8] sm:$0xff] (!%p1094_p1) }
 0x86f   : > { %s911_s15 = smul.f32 (!%p1094_p1), 0.0027777778, %s1095_s27 }
 0x870   : > { %s912_s8 = smul.f32 (!%p1094_p1), 0.0027777778, %s1096_s14 }
 0x871   : > { %s913_s23 = smul.f32 %s911_s15, %s911_s15 }
 0x873   : > { %s914_s6 = ssub.f32 %s912_s8, %s913_s23 }
 0x875   : > { %s915_s28 = sadd.f32 1e-05, %s914_s6 }
 0x877   : > { %v916_v37 = vstv %s915_s28 }
 0x878   : > { %1349 = vrsqrt.f32 %v916_v37 }
 0x882   : > { %v1350_v38 = vpop.eup %1349 }
 0x883   : > { %1282 = vpush %v1350_v38 }
 0x8b4   : > { %s1283_s29 = spop %1282 }
 0x8b5   : > { %s919_s30 = smul.f32 %s1283_s29, %s1097_s10 }
 0x8b7   : > { %v923_v41 = vstv %s919_s30 }
 0x8b8   : > { %v924_v42 = vmul.f32 %v923_v41, %v921_v39  ;;  %v925_v43 = vmul.f32 %v923_v41, %v922_v40 }
 0x8ba   : > { %v927_v44 = vsel %vm926_vm0, %v924_v42, -inf  ;;  %v930_v45 = vsel %vm926_vm0, %v925_v43, -inf }
 0x8bb   : > { %928 = vmax.xlane.f32.xlu0 %v927_v44 }
 0x8bf   : > { %931 = vmax.xlane.f32.xlu0 %v930_v45 }
 0x948   : > { %v929_v46 = vpop.xlane.xlu0 %928 }
 0x949   : > { %v933_v47 = vsub.f32 %v924_v42, %v929_v46 }
 0x94b   : > { %v935_v48 = vmul.f32 1.442695, %v933_v47 }
 0x94c   : > { %v932_v49 = vpop.xlane.xlu0 %931 }
 0x94d   : > { %1351 = vpow2.f32 %v935_v48  ;;  %v934_v50 = vsub.f32 %v925_v43, %v932_v49 }
 0x94f   : > { %v937_v51 = vmul.f32 1.442695, %v934_v50 }
 0x951   : > { %1353 = vpow2.f32 %v937_v51 }
 0x957   : > { %v1352_v52 = vpop.eup %1351 }
 0x958   : > { %v939_v53 = vsel %vm926_vm0, %v1352_v52, 0.0 }
 0x959   : > { %940 = vadd.xlane.f32.xlu1 %v939_v53 }
 0x95b   : > { %v1354_v54 = vpop.eup %1353 }
 0x95c   : > { %v942_v55 = vsel %vm926_vm0, %v1354_v54, 0.0 }
 0x95d   : > { %943 = vadd.xlane.f32.xlu1 %v942_v55 }
 0x9e6   : > { %v941_v56 = vpop.xlane.xlu1 %940 }
 0x9e7   : > { %1355 = vrcp.f32 %v941_v56 }
 0x9ea   : > { %v944_v57 = vpop.xlane.xlu1 %943 }
 0x9eb   : > { %1357 = vrcp.f32 %v944_v57 }
 0x9f1   : > { %v1356_v58 = vpop.eup %1355 }
 0x9f2   : > { %v946_v59 = vmul.f32 %v1356_v58, %v1352_v52 }
 0x9f4   : > { %949 = vst.msk [vmem:[%s1520_s16] sm:$0xff] %vm926_vm0, %v946_v59 }
 0x9f5   : > { %v1358_v60 = vpop.eup %1357 }
 0x9f6   : > { %v948_v61 = vmul.f32 %v1358_v60, %v1354_v54 }
 0x9f8   : > { %950 = vst.msk [vmem:[%s1520_s16 + $0x8] sm:$0xff] %vm926_vm0, %v948_v61 }
 0x9f9 PF: > { %p1098_p2 = scmp.eq.s32.totalorder %s1404_s19, 3 }
 0x9fa   : > { %vm955_vm1 = vcmask (!%p1098_p2), 72704   ;;  %v1421_v62 = vmov (!%p1098_p2), 0.0  }
 0x9fb   : > { %954 = sbr.rel (%p1098_p2) target bundleno = 2562 (0xa02), region = 92  ;;  %956 = vst.msk [vmem:[%s1520_s16] sm:$0xff] (!%p1098_p2), %vm955_vm1, %v1421_v62  ;;  %957 = vst.msk [vmem:[%s1520_s16 + $0x8] sm:$0xff] (!%p1098_p2), %vm955_vm1, %v1421_v62 }
 0xa02 PF: > { %s16_s22 = sadd.s32 1, %s1416_s22   ;;  %s1700_s18 = smov %s1408_s20 }
 0xa03   : > { %p13_p4 = scmp.ge.s32.totalorder %s16_s22, 14   ;;  %s1701_s19 = smov %s1412_s21 }
 0xa04   : > { %s1702_s20 = smov %s1705_s24  ;;  %s1703_s21 = smov %s1709_s25 }
 0xa05   :  { %15 = sbr.rel (!%p13_p4) target bundleno = 3 (0x3), region = 146 }
 0xa0c   :  { %980 = vsyncpa [#allocation6], 1 }
 0xa0d   :  { %982 = vsyncpa [#allocation6 + $0x1], 1 }

</bundles_post_ra>
